<compile_context>
chip_gen: v7x
topology: tpu7x:2x2x1
jax: 0.10.0
libtpu: 0.0.40
codegen_flags: <defaults>
</compile_context>

<pallas_src>
import jax
import jax.numpy as jnp
from jax.experimental import pallas as pl
from jax.experimental.pallas import tpu as pltpu

INPUT_DIM = 128
HIDDEN_DIM = 256
LATENT_DIM = 32


def encoder_kernel(x_ref, w1_ref, b1_ref, w2_ref, b2_ref, o_ref):
    # x_ref : [tb, D]        f32   (cast to bf16 in-kernel, hidden under DMA/MXU)
    # w1_ref: [D, H]         bf16    b1_ref: [1, H]        f32
    # w2_ref: [H, out_pad]   bf16    b2_ref: [1, out_pad]  f32  (fused heads, zero-padded)
    # o_ref : [tb, out_pad]  bf16    cols [0:L]=mean, [L:2L]=log_var, rest zero
    x = x_ref[...].astype(jnp.bfloat16)
    h = jnp.dot(x, w1_ref[...], preferred_element_type=jnp.float32) + b1_ref[...]
    h = jnp.maximum(h, 0.0)                              # ReLU + bias in f32 (v5e-safe VPU)
    y = jnp.dot(h.astype(jnp.bfloat16), w2_ref[...],
                preferred_element_type=jnp.float32) + b2_ref[...]
    o_ref[...] = y.astype(o_ref.dtype)                   # lane-dense 128-wide bf16 store


def prepare_encoder_params(w1, b1, w21, b21, w22, b22):
    """One-time parameter preparation (hoisted out of the per-call forward path).

    Fuses the two latent heads into a single [H, out_pad] matmul whose output is
    zero-padded to a multiple of 128 lanes (unmasked vst in the kernel), and casts
    the matmul operands to bf16. Biases stay f32.
    """
    H, L = w21.shape
    out_pad = max(128, ((2 * L + 127) // 128) * 128)
    w2 = jnp.pad(jnp.concatenate([w21, w22], axis=1), ((0, 0), (0, out_pad - 2 * L)))
    b2 = jnp.pad(jnp.concatenate([b21, b22], axis=1), ((0, 0), (0, out_pad - 2 * L)))
    return {
        "w1": w1.astype(jnp.bfloat16),
        "b1": b1.astype(jnp.float32),
        "w2": w2.astype(jnp.bfloat16),
        "b2": b2.astype(jnp.float32),
        "latent_dim": int(L),
        "out_pad": int(out_pad),
    }


def encoder_forward(x, params, *, tile_b=512):
    """x: [B, D] f32. Returns (mean, log_var), each [B, L] bf16."""
    B, D = x.shape
    w1, b1, w2, b2 = params["w1"], params["b1"], params["w2"], params["b2"]
    L, out_pad = params["latent_dim"], params["out_pad"]
    H = w1.shape[1]

    tile_b = min(tile_b, B)
    assert B % tile_b == 0, "batch must be a multiple of tile_b"
    assert tile_b % 8 == 0, "tile_b must be a multiple of 8 (sublane)"
    grid = (B // tile_b,)

    # Advisory cost hint for XLA's scheduler around this tiny custom call.
    flops = 2 * B * D * H + 2 * B * H * out_pad
    bytes_accessed = (B * D * 4                # x (f32 in)
                      + D * H * 2 + H * 4      # W1 bf16 + b1 f32
                      + H * out_pad * 2 + out_pad * 4   # W2 bf16 + b2 f32
                      + B * out_pad * 2)       # output bf16
    cost = pl.CostEstimate(flops=flops, transcendentals=0, bytes_accessed=bytes_accessed)

    out = pl.pallas_call(
        encoder_kernel,
        out_shape=jax.ShapeDtypeStruct((B, out_pad), jnp.bfloat16),
        grid_spec=pltpu.PrefetchScalarGridSpec(
            num_scalar_prefetch=0,
            grid=grid,
            in_specs=[
                pl.BlockSpec((tile_b, D), lambda i: (i, 0)),    # x tile over batch
                # Grid-invariant operands (constant index_map): fetched once.
                pl.BlockSpec((D, H), lambda i: (0, 0)),         # W1 (full)
                pl.BlockSpec((1, H), lambda i: (0, 0)),         # b1 (full)
                pl.BlockSpec((H, out_pad), lambda i: (0, 0)),   # W2 (fused heads)
                pl.BlockSpec((1, out_pad), lambda i: (0, 0)),   # b2 (fused heads)
            ],
            out_specs=pl.BlockSpec((tile_b, out_pad), lambda i: (i, 0)),
        ),
        compiler_params=pltpu.CompilerParams(
            dimension_semantics=("parallel",),   # >=2 steps -> both v7x TCs get work
        ),
        cost_estimate=cost,
    )(x, w1, b1, w2, b2)

    mean = out[:, :L]
    log_var = out[:, L:2 * L]
    return mean, log_var


def init_params(key, input_dim, hidden_dim, latent_dim):
    # Mimics nn.Linear's uniform(-1/sqrt(fan_in), 1/sqrt(fan_in)); stored as [in, out].
    ks = jax.random.split(key, 6)
    bound1 = 1.0 / jnp.sqrt(input_dim)
    bound2 = 1.0 / jnp.sqrt(hidden_dim)
    w1 = jax.random.uniform(ks[0], (input_dim, hidden_dim), jnp.float32, -bound1, bound1)
    b1 = jax.random.uniform(ks[1], (1, hidden_dim), jnp.float32, -bound1, bound1)
    w21 = jax.random.uniform(ks[2], (hidden_dim, latent_dim), jnp.float32, -bound2, bound2)
    b21 = jax.random.uniform(ks[3], (1, latent_dim), jnp.float32, -bound2, bound2)
    w22 = jax.random.uniform(ks[4], (hidden_dim, latent_dim), jnp.float32, -bound2, bound2)
    b22 = jax.random.uniform(ks[5], (1, latent_dim), jnp.float32, -bound2, bound2)
    return w1, b1, w21, b21, w22, b22


def encoder_reference(x, w1, b1, w21, b21, w22, b22):
    # Same bf16-operand / f32-accumulation recipe as the kernel, in plain jnp
    # (kept in f32 output; kernel additionally rounds its output to bf16).
    h = jnp.dot(x.astype(jnp.bfloat16), w1.astype(jnp.bfloat16),
                preferred_element_type=jnp.float32) + b1
    h = jnp.maximum(h, 0.0)
    hb = h.astype(jnp.bfloat16)
    mean = jnp.dot(hb, w21.astype(jnp.bfloat16), preferred_element_type=jnp.float32) + b21
    log_var = jnp.dot(hb, w22.astype(jnp.bfloat16), preferred_element_type=jnp.float32) + b22
    return mean, log_var


if __name__ == "__main__":
    key = jax.random.PRNGKey(0)
    kx, kp = jax.random.split(key)

    # B=1024 with tile_b=512 -> grid=(2,): exactly one parallel step per v7x
    # TensorCore, and only 1-2 large tiles on v6e/v5e (step overhead amortized).
    B = 1024
    x = jax.random.normal(kx, (B, INPUT_DIM), jnp.float32)
    raw_params = init_params(kp, INPUT_DIM, HIDDEN_DIM, LATENT_DIM)

    # One-time parameter prep (head fusion + bf16 casts) — NOT on the per-call path.
    params = jax.tree_util.tree_map(
        lambda v: jax.block_until_ready(v) if isinstance(v, jax.Array) else v,
        prepare_encoder_params(*raw_params))

    mean, log_var = encoder_forward(x, params, tile_b=512)
    mean, log_var = jax.block_until_ready((mean, log_var))

    ref_mean, ref_log_var = encoder_reference(x, *raw_params)
    assert mean.shape == (B, LATENT_DIM) and log_var.shape == (B, LATENT_DIM)
    # Kernel output is bf16 (review-suggested writeback halving); ~0.4% relative
    # rounding on top of the shared bf16-matmul recipe, hence the 1e-2 tolerance.
    assert jnp.allclose(mean.astype(jnp.float32), ref_mean, atol=1e-2, rtol=1e-2)
    assert jnp.allclose(log_var.astype(jnp.float32), ref_log_var, atol=1e-2, rtol=1e-2)

    print("KERNEL_OK")
</pallas_src>

<mosaic_0001>
module attributes {stable_mosaic.version = 11 : i64} {
  func.func @encoder_kernel(%arg0: i32, %arg1: memref<512x128xf32, #tpu.memory_space<vmem>>, %arg2: memref<128x256xbf16, #tpu.memory_space<vmem>>, %arg3: memref<1x256xf32, #tpu.memory_space<vmem>>, %arg4: memref<256x128xbf16, #tpu.memory_space<vmem>>, %arg5: memref<1x128xf32, #tpu.memory_space<vmem>>, %arg6: memref<512x128xbf16, #tpu.memory_space<vmem>>) attributes {dimension_semantics = [#tpu.dimension_semantics<parallel>], iteration_bounds = array<i64: 2>, scalar_prefetch = 0 : i64, scratch_operands = 0 : i64, tpu.core_type = #tpu.core_type<tc>, window_params = [{transform_indices = @transform_0, window_bounds = array<i64: 512, 128>}, {pipeline_mode = #tpu.pipeline_mode<synchronous>, transform_indices = @transform_1, window_bounds = array<i64: 128, 256>}, {pipeline_mode = #tpu.pipeline_mode<synchronous>, transform_indices = @transform_2, window_bounds = array<i64: 1, 256>}, {pipeline_mode = #tpu.pipeline_mode<synchronous>, transform_indices = @transform_3, window_bounds = array<i64: 256, 128>}, {pipeline_mode = #tpu.pipeline_mode<synchronous>, transform_indices = @transform_4, window_bounds = array<i64: 1, 128>}, {transform_indices = @transform_5, window_bounds = array<i64: 512, 128>}]} {
    %c0 = arith.constant 0 : index
    %c0_0 = arith.constant 0 : index
    %0 = vector.load %arg1[%c0, %c0_0] : memref<512x128xf32, #tpu.memory_space<vmem>>, vector<512x128xf32>
    %1 = arith.truncf %0 : vector<512x128xf32> to vector<512x128xbf16>
    %c0_1 = arith.constant 0 : index
    %c0_2 = arith.constant 0 : index
    %2 = vector.load %arg2[%c0_1, %c0_2] : memref<128x256xbf16, #tpu.memory_space<vmem>>, vector<128x256xbf16>
    %cst = arith.constant dense<0.000000e+00> : vector<512x256xf32>
    %3 = tpu.matmul %1, %2, %cst {dimension_numbers = #tpu.dot_dimension_numbers<[1], [0], [0], [1], [0, 0, 1, 1], [], []>} : vector<512x128xbf16>, vector<128x256xbf16>, vector<512x256xf32> -> vector<512x256xf32>
    %c0_3 = arith.constant 0 : index
    %c0_4 = arith.constant 0 : index
    %4 = vector.load %arg3[%c0_3, %c0_4] : memref<1x256xf32, #tpu.memory_space<vmem>>, vector<1x256xf32>
    %5 = vector.broadcast %4 : vector<1x256xf32> to vector<512x256xf32>
    %6 = arith.addf %3, %5 : vector<512x256xf32>
    %cst_5 = arith.constant 0.000000e+00 : f32
    %7 = vector.broadcast %cst_5 : f32 to vector<512x256xf32>
    %8 = arith.maximumf %6, %7 : vector<512x256xf32>
    %9 = arith.truncf %8 : vector<512x256xf32> to vector<512x256xbf16>
    %c0_6 = arith.constant 0 : index
    %c0_7 = arith.constant 0 : index
    %10 = vector.load %arg4[%c0_6, %c0_7] : memref<256x128xbf16, #tpu.memory_space<vmem>>, vector<256x128xbf16>
    %cst_8 = arith.constant dense<0.000000e+00> : vector<512x128xf32>
    %11 = tpu.matmul %9, %10, %cst_8 {dimension_numbers = #tpu.dot_dimension_numbers<[1], [0], [0], [1], [0, 0, 1, 1], [], []>} : vector<512x256xbf16>, vector<256x128xbf16>, vector<512x128xf32> -> vector<512x128xf32>
    %c0_9 = arith.constant 0 : index
    %c0_10 = arith.constant 0 : index
    %12 = vector.load %arg5[%c0_9, %c0_10] : memref<1x128xf32, #tpu.memory_space<vmem>>, vector<1x128xf32>
    %13 = vector.broadcast %12 : vector<1x128xf32> to vector<512x128xf32>
    %14 = arith.addf %11, %13 : vector<512x128xf32>
    %15 = arith.truncf %14 : vector<512x128xf32> to vector<512x128xbf16>
    %c0_11 = arith.constant 0 : index
    %c0_12 = arith.constant 0 : index
    %16 = vector.load %arg6[%c0_11, %c0_12] : memref<512x128xbf16, #tpu.memory_space<vmem>>, vector<512x128xbf16>
    tpu.vector_store %arg6[%c0_11, %c0_12], %15 {strides = array<i32>} : memref<512x128xbf16, #tpu.memory_space<vmem>>, vector<512x128xbf16>,
    return
  }
  func.func @transform_0(%arg0: i32) -> (i32, i32) {
    %c0_i32 = arith.constant 0 : i32
    %c0_i32_0 = arith.constant 0 : i32
    return %arg0, %c0_i32 : i32, i32
  }
  func.func @transform_1(%arg0: i32) -> (i32, i32) {
    %c0_i32 = arith.constant 0 : i32
    %c0_i32_0 = arith.constant 0 : i32
    %c0_i32_1 = arith.constant 0 : i32
    return %c0_i32, %c0_i32_0 : i32, i32
  }
  func.func @transform_2(%arg0: i32) -> (i32, i32) {
    %c0_i32 = arith.constant 0 : i32
    %c0_i32_0 = arith.constant 0 : i32
    %c0_i32_1 = arith.constant 0 : i32
    return %c0_i32, %c0_i32_0 : i32, i32
  }
  func.func @transform_3(%arg0: i32) -> (i32, i32) {
    %c0_i32 = arith.constant 0 : i32
    %c0_i32_0 = arith.constant 0 : i32
    %c0_i32_1 = arith.constant 0 : i32
    return %c0_i32, %c0_i32_0 : i32, i32
  }
  func.func @transform_4(%arg0: i32) -> (i32, i32) {
    %c0_i32 = arith.constant 0 : i32
    %c0_i32_0 = arith.constant 0 : i32
    %c0_i32_1 = arith.constant 0 : i32
    return %c0_i32, %c0_i32_0 : i32, i32
  }
  func.func @transform_5(%arg0: i32) -> (i32, i32) {
    %c0_i32 = arith.constant 0 : i32
    %c0_i32_0 = arith.constant 0 : i32
    return %arg0, %c0_i32 : i32, i32
  }
}

</mosaic_0001>

<bundles_post_ra>
// kernel: tpu_custom_call.1
= control target key start
LH: loop header
LB: loop body
LE: loop exit
PB: predicated region body
PF: predicated region fallthrough
CT: control target
= control target key end

     0   :  { %10 = vsyncpa [#allocation3], 0  ;;  %s3213_s0 = inlined_call_operand.hbm [shape: f32[1024,128], index: 0, kind: input, shape index: {}]   ;;  %s3214_s1 = inlined_call_operand.hbm [shape: bf16[128,256], index: 1, kind: input, shape index: {}]   ;;  %s3215_s2 = inlined_call_operand.vmem [shape: f32[1,256], index: 2, kind: input, shape index: {}]   ;;  %s3216_s3 = inlined_call_operand.hbm [shape: bf16[256,128], index: 3, kind: input, shape index: {}]   ;;  %s3217_s4 = inlined_call_operand.vmem [shape: f32[1,128], index: 4, kind: input, shape index: {}]   ;;  %s3218_s5 = inlined_call_operand.hbm [shape: bf16[1024,128], index: 5, kind: output, shape index: {}]  }
   0x1   :  { %12 = vsyncpa [#allocation3 + $0x1], 0 }
   0x2   :  { %13 = vsyncpa [#allocation6], 0 }
   0x3   :  { %14 = vsyncpa [#allocation4], 0 }
   0x4   :  { %16 = vsyncpa [#allocation4 + $0x1], 0  ;;  %s2591_s18 = smov 0   ;;  %s2593_s19 = smov 0  }
   0x5   :  { %s2595_s20 = smov 0   ;;  %s2597_s21 = smov 0  }
   0x6 LB: > { %s2612_s22 = sadd.s32 4294967295, %s2548_s21   ;;  %s1874_s23 = sadd.s32 4294967294, %s2548_s21   ;;  %s2548_s21 = sphi %s2597_s21, %s3238_s21   ;;  %s2544_s20 = sphi %s2595_s20, %s3237_s20   ;;  %s2540_s19 = sphi %s2593_s19, %s3236_s19   ;;  %s2536_s18 = sphi %s2591_s18, %s3235_s18  }
   0x7   : > { %p42_p0 = scmp.ne.s32.totalorder %s2540_s19, %s2536_s18  ;;  %p3219_p1 = scmp.eq.s32.totalorder %s2612_s22, 0 }
   0x8   : > { %p156_p3 = scmp.eq.s32.totalorder %s1874_s23, 1  ;;  %p1875_p5 = scmp.ge.s32.totalorder %s2548_s21, 1 }
   0x9   : > { %p2621_p4 = por %p3219_p1, %p42_p0  ;;  %p163_p7 = scmp.lt.s32.totalorder %s2548_s21, 3 }
   0xa   : > { %p2626_p6 = por %p156_p3, %p42_p0  ;;  %s2550_s27 = smov [#allocation5]  }
   0xb   : > { %s3222_s24 = scalar_select %p2621_p4, 1, 0 }
   0xc   : > { %s3223_s25 = scalar_select %p2626_p6, 1, 0 }
   0xd   : > { %p2631_p8 = pnand %p1875_p5, %p163_p7  ;;  %s175_s28 = sshll.u32 %s2550_s27, 4  ;;  %s2635_s28 = int_to_ptr.vmem [resolvable:$true] %s175_s28 }
   0xe   : > { %s2551_s30 = smov [#allocation7]   ;;  %s2392_s9 = scalar_lea.hbm %s3214_s1, 2048 }
   0xf   : > { %p2290_p9 = pneg %p2631_p8  ;;  %s191_s6 = sshll.u32 %s2551_s30, 4  ;;  %s2646_s6 = int_to_ptr.vmem [resolvable:$true] %s191_s6 }
  0x10   : > { %p2393_p12 = scmp.ne.s32.totalorder %s3214_s1, %s2392_s9  ;;  %p2399_p5 = scmp.lt.u32.totalorder %s2392_s9, %s3214_s1 }
  0x11   : > { %p2642_p11 = pnand %p2290_p9, %p3219_p1 }
  0x13   : > { %p2394_p13 = pneg %p2642_p11 }
  0x15   : > { %p2395_p0 = pnand %p2394_p13, %p2393_p12 }
  0x17   : > { %p2396_p3 = pneg %p2395_p0 }
  0x19   : > { %p2401_p7 = pnand %p2399_p5, %p2396_p3 }
  0x1b   : > { %2404 = shalt.err (!%p2401_p7)
}
  0x1c   : > { %s2405_s14 = scalar_lea.vmem %s2635_s28, 2048  ;;  %p2413_p2 = scmp.lt.s32.totalorder %s2635_s28, %s2635_s28 }
  0x1d   : > { %p2406_p9 = scmp.ne.s32.totalorder %s2635_s28, %s2405_s14  ;;  %p2414_p12 = scmp.lt.s32.totalorder %s2405_s14, %s2405_s14 }
  0x1f   : > { %p2408_p10 = pnand %p2406_p9, %p2394_p13  ;;  %p2415_p0 = por %p2414_p12, %p2413_p2 }
  0x21   : > { %p2409_p1 = pneg %p2408_p10 }
  0x23   : > { %p2416_p6 = pnand %p2415_p0, %p2409_p1 }
  0x25   : > { %2419 = shalt.err (!%p2416_p6)
}
  0x26   : > { %s2552_s15 = smov 128   ;;  %s2553_s16 = smov 8  }
  0x27   : > { %2293 = dma.hbm_to_vmem [thread:$0]  (!%p2642_p11), %s3214_s1, 2048, %s2635_s28, [#allocation6], %s2552_s15, %s2552_s15, %s2553_s16  }
  0x28   : > { %s2420_s7 = scalar_lea.hbm %s3216_s3, 2048 }
  0x29   : > { %p2421_p1 = scmp.ne.s32.totalorder %s3216_s3, %s2420_s7  ;;  %p2427_p10 = scmp.lt.u32.totalorder %s2420_s7, %s3216_s3 }
  0x2b   : > { %p2423_p2 = pnand %p2421_p1, %p2394_p13 }
  0x2d   : > { %p2424_p6 = pneg %p2423_p2 }
  0x2f   : > { %p2429_p3 = pnand %p2427_p10, %p2424_p6 }
  0x31   : > { %2432 = shalt.err (!%p2429_p3)
}
  0x32   : > { %s2433_s28 = scalar_lea.vmem %s2646_s6, 2048  ;;  %p2441_p12 = scmp.lt.s32.totalorder %s2646_s6, %s2646_s6 }
  0x33   : > { %p2434_p5 = scmp.ne.s32.totalorder %s2646_s6, %s2433_s28  ;;  %p2442_p0 = scmp.lt.s32.totalorder %s2433_s28, %s2433_s28 }
  0x35   : > { %p2436_p7 = pnand %p2434_p5, %p2394_p13  ;;  %p2443_p1 = por %p2442_p0, %p2441_p12 }
  0x37   : > { %p2437_p9 = pneg %p2436_p7 }
  0x39   : > { %p2444_p2 = pnand %p2443_p1, %p2437_p9 }
  0x3b   : > { %2447 = shalt.err (!%p2444_p2)
}
  0x3c   : > { %s2554_s12 = smov 64   ;;  %s2555_s13 = smov 4  }
  0x3d   : > { %2296 = dma.hbm_to_vmem [thread:$0]  (!%p2642_p11), %s3216_s3, 2048, %s2646_s6, [#allocation6], %s2554_s12, %s2554_s12, %s2555_s13  }
  0x3e   : > { %s2704_s23 = sadd.s32 1, %s2548_s21   ;;  %s29_s30 = sadd.s32 1, %s2544_s20 }
  0x3f   : > { %s26_s27 = ssub.s32 %s2548_s21, %s2704_s23  ;;  %p36_p6 = scmp.ne.s32.totalorder %s2544_s20, %s2540_s19 }
  0x40   : > { %p27_p13 = scmp.eq.s32.totalorder %s26_s27, 0  ;;  %p37_p10 = scmp.eq.s32.totalorder %s2548_s21, 0 }
  0x41   : > { %p3226_p5 = scmp.eq.s32.totalorder %s2612_s22, 1  ;;  %p2307_p9 = scmp.lt.s32.totalorder %s2548_s21, 2 }
  0x42   : > { %s2713_s7 = scalar_select %p27_p13, %s2544_s20, %s29_s30  }
  0x43   : > { %p38_p3 = por %p37_p10, %p36_p6  ;;  %p2717_p7 = por %p3226_p5, %p36_p6 }
  0x44   : > { %s208_s29 = sand.u32 1, %s2544_s20   ;;  %s1989_s6 = sshll.u32 %s2548_s21, 13 }
  0x45   : > { %s3227_s8 = scalar_select %p2717_p7, 1, 0 }
  0x46   : > { %s1879_s9 = sshll.u32 %s208_s29, 9  ;;  %s2727_s28 = scalar_lea.hbm %s3213_s0, %s1989_s6 }
  0x47   : > { %s212_s12 = scalar_lea.vmem [#allocation2], %s1879_s9  ;;  %p2731_p11 = pnand %p2307_p9, %p38_p3 }
  0x48   : > { %s219_s13 = sshll.u32 %s212_s12, 4  ;;  %s2735_s17 = scalar_lea.sflag [#allocation3], %s208_s29  ;;  %s2729_s13 = int_to_ptr.vmem [resolvable:$true] %s219_s13 }
  0x49   : > { %s2448_s27 = scalar_lea.hbm %s2727_s28, 8192  ;;  %p2450_p0 = pneg %p2731_p11 }
  0x4a   : > { %p2449_p12 = scmp.ne.s32.totalorder %s2727_s28, %s2448_s27  ;;  %s2453_s6 = scalar_lea.hbm %s3213_s0, 16384 }
  0x4b   : > { %p2454_p13 = scmp.lt.u32.totalorder %s2727_s28, %s3213_s0  ;;  %p2455_p6 = scmp.lt.u32.totalorder %s2453_s6, %s2448_s27 }
  0x4c   : > { %p2451_p1 = pnand %p2450_p0, %p2449_p12  ;;  %p2457_p3 = scmp.lt.u32.totalorder %s2448_s27, %s2727_s28 }
  0x4d   : > { %p2456_p10 = por %p2455_p6, %p2454_p13 }
  0x4e   : > { %p2452_p2 = pneg %p2451_p1 }
  0x4f   : > { %p2458_p5 = por %p2457_p3, %p2456_p10 }
  0x51   : > { %p2459_p9 = pnand %p2458_p5, %p2452_p2 }
  0x53   : > { %2462 = shalt.err (!%p2459_p9)
}
  0x54   : > { %s2463_s29 = scalar_lea.vmem %s2729_s13, 8192  ;;  %s2556_s12 = smov [#allocation2]  }
  0x55   : > { %p2464_p12 = scmp.ne.s32.totalorder %s2729_s13, %s2463_s29  ;;  %s2468_s30 = sshll.u32 %s2556_s12, 4  ;;  %s2469_s30 = int_to_ptr.vmem [resolvable:$false] %s2468_s30 }
  0x56   : > { %s2470_s9 = scalar_lea.vmem %s2469_s30, 16384  ;;  %p2471_p4 = scmp.lt.s32.totalorder %s2729_s13, %s2469_s30 }
  0x57   : > { %p2466_p1 = pnand %p2464_p12, %p2450_p0  ;;  %p2472_p13 = scmp.lt.s32.totalorder %s2470_s9, %s2463_s29 }
  0x59   : > { %p2467_p7 = pneg %p2466_p1  ;;  %p2473_p6 = por %p2472_p13, %p2471_p4 }
  0x5b   : > { %p2474_p10 = pnand %p2473_p6, %p2467_p7 }
  0x5d   : > { %2477 = shalt.err (!%p2474_p10)
}
  0x5e   : > { %2300 = dma.hbm_to_vmem [thread:$0]  (!%p2731_p11), %s2727_s28, 8192, %s2729_s13, %s2735_s17, %s2552_s15, %s2552_s15, %s2553_s16  }
  0x5f   : > { %231 = sbr.rel (%p2631_p8) target bundleno = 843 (0x34b), region = 40  ;;  %s2769_s27 = sand.u32 (!%p2631_p8), 1, %s2540_s19  }
  0x60   : > { %s1883_s6 = sshll.u32 (!%p2631_p8), %s2769_s27, 9  ;;  %s234_s10 = scalar_lea.sflag (!%p2631_p8), [#allocation3], %s2769_s27 }
  0x61   : > { %s2773_s11 = scalar_lea.vmem (!%p2631_p8), [#allocation2], %s1883_s6  ;;  %p3229_p4 = scmp.ne.s32.totalorder (!%p2631_p8), %s3222_s24, 0 }
  0x66   : > { %2523 = dma.done.wait (%p3229_p4), %s234_s10, 8192  }
  0x67   : > { %2525 = vsyncadd (%p3229_p4), %s234_s10, 4294959104  ;;  %p3230_p7 = scmp.eq.s32.totalorder %s2612_s22, 0 }
  0x69   : > { %2527 = dma.done.wait (%p3230_p7), [#allocation6], 4096   ;;  %p3231_p8 = pmov %p3230_p7 }
  0x6a   : > { %v2557_v0 = vmov 0   ;;  %v2352_v1 = vld [vmem:[#allocation5 + $0x4] ss:$8 sps:$4 sm:$0xff]   ;;  %v2354_v2 = vld [vmem:[#allocation5] ss:$8 sps:$4 sm:$0xff]   ;;  %v277_v20 = vld [vmem:[%s2773_s11 + $0x10] sm:$0xff] }
  0x6b   : > { %2529 = vsyncadd (%p3231_p8), [#allocation6], 4294963200  ;;  %511 = vmatprep.mubr.bf16.mxu0 %v2557_v0  ;;  %2246 = vmatprep.subr.bf16.mxu1 %v2557_v0  ;;  %v2355_v3 = vld [vmem:[#allocation5 + $0x14] ss:$8 sps:$4 sm:$0xff]   ;;  %v2357_v4 = vld [vmem:[#allocation5 + $0x10] ss:$8 sps:$4 sm:$0xff]  }
  0x6c   : > { %479 = vmatprep.subr.bf16.mxu0 %v2352_v1  ;;  %v2358_v5 = vld [vmem:[#allocation5 + $0x24] ss:$8 sps:$4 sm:$0xff]   ;;  %v2360_v6 = vld [vmem:[#allocation5 + $0x20] ss:$8 sps:$4 sm:$0xff]   ;;  %v2361_v7 = vld [vmem:[#allocation5 + $0x34] ss:$8 sps:$4 sm:$0xff]  }
  0x6d   : > { %480 = vmatpush1.bf16.msra.mxu0 %v2354_v2  ;;  %v2363_v8 = vld [vmem:[#allocation5 + $0x30] ss:$8 sps:$4 sm:$0xff]   ;;  %v2364_v9 = vld [vmem:[#allocation5 + $0x44] ss:$8 sps:$4 sm:$0xff]   ;;  %v2366_v10 = vld [vmem:[#allocation5 + $0x40] ss:$8 sps:$4 sm:$0xff]  }
  0x6e   : > { %481 = vmatprep.subr.bf16.mxu0 %v2355_v3  ;;  %v2367_v11 = vld [vmem:[#allocation5 + $0x54] ss:$8 sps:$4 sm:$0xff]   ;;  %v2369_v12 = vld [vmem:[#allocation5 + $0x50] ss:$8 sps:$4 sm:$0xff]   ;;  %v2370_v13 = vld [vmem:[#allocation5 + $0x64] ss:$8 sps:$4 sm:$0xff]  }
  0x6f   : > { %v2372_v14 = vld [vmem:[#allocation5 + $0x60] ss:$8 sps:$4 sm:$0xff]   ;;  %v2373_v15 = vld [vmem:[#allocation5 + $0x74] ss:$8 sps:$4 sm:$0xff]   ;;  %v2375_v16 = vld [vmem:[#allocation5 + $0x70] ss:$8 sps:$4 sm:$0xff]  }
  0x70   : > { %v275_v17 = vld [vmem:[%s2773_s11] sm:$0xff]  ;;  %v276_v18 = vld [vmem:[%s2773_s11 + $0x8] sm:$0xff]  ;;  %v278_v21 = vld [vmem:[%s2773_s11 + $0x18] sm:$0xff]  ;;  %s1886_s28 = sshll.u32 %s2769_s27, 8  ;;  %s2054_s14 = sshll.u32 %s2612_s22, 12 }
  0x71   : > { %482 = vmatpush1.bf16.msra.mxu0 %v2357_v4  ;;  %v339_v19 = vpack.c.bf16 %v276_v18, %v275_v17  ;;  %v340_v22 = vpack.c.bf16 %v278_v21, %v277_v20  ;;  %v279_v23 = vld [vmem:[%s2773_s11 + $0x20] sm:$0xff]  ;;  %v280_v24 = vld [vmem:[%s2773_s11 + $0x28] sm:$0xff]  ;;  %v281_v26 = vld [vmem:[%s2773_s11 + $0x30] sm:$0xff]  ;;  %s3062_s13 = scalar_lea.vmem [#allocation8], %s1886_s28  ;;  %s3166_s30 = scalar_lea.hbm %s3218_s5, %s2054_s14 }
  0x72   : > { %483 = vmatprep.subr.bf16.mxu0 %v2358_v5  ;;  %v341_v25 = vpack.c.bf16 %v280_v24, %v279_v23  ;;  %v282_v27 = vld [vmem:[%s2773_s11 + $0x38] sm:$0xff]  ;;  %v283_v29 = vld [vmem:[%s2773_s11 + $0x40] sm:$0xff]  ;;  %v284_v30 = vld [vmem:[%s2773_s11 + $0x48] sm:$0xff]  ;;  %s1782_s17 = sshll.u32 %s3062_s13, 4  ;;  %s1769_s22 = scalar_lea.sflag [#allocation4], %s2769_s27  ;;  %s3168_s17 = int_to_ptr.vmem [resolvable:$true] %s1782_s17 }
  0x73   : > { %v342_v28 = vpack.c.bf16 %v282_v27, %v281_v26  ;;  %v343_v31 = vpack.c.bf16 %v284_v30, %v283_v29  ;;  %v285_v32 = vld [vmem:[%s2773_s11 + $0x50] sm:$0xff]  ;;  %v286_v33 = vld [vmem:[%s2773_s11 + $0x58] sm:$0xff]  ;;  %v287_v35 = vld [vmem:[%s2773_s11 + $0x60] sm:$0xff]  ;;  %s2478_s9 = scalar_lea.vmem %s3168_s17, 4096  ;;  %p3232_p0 = scmp.ne.s32.totalorder %s3227_s8, 0 }
  0x74   : > { %v344_v34 = vpack.c.bf16 %v286_v33, %v285_v32  ;;  %v288_v36 = vld [vmem:[%s2773_s11 + $0x68] sm:$0xff]  ;;  %v2376_v37 = vld [vmem:[#allocation7] sm:$0xff]   ;;  %v289_v40 = vld [vmem:[%s2773_s11 + $0x70] sm:$0xff]  ;;  %p2479_p11 = scmp.ne.s32.totalorder %s3168_s17, %s2478_s9  ;;  %s2558_s6 = smov [#allocation8]  }
  0x75   : > { %484 = vmatpush1.bf16.msra.mxu0 %v2360_v6  ;;  %2262 = vmatpush1.bf16.msra.mxu1 %v2376_v37  ;;  %v345_v38 = vpack.c.bf16 %v288_v36, %v287_v35  ;;  %v2377_v39 = vld [vmem:[#allocation7 + $0x8] sm:$0xff]   ;;  %v290_v41 = vld [vmem:[%s2773_s11 + $0x78] sm:$0xff]  ;;  %v2378_v42 = vld [vmem:[#allocation7 + $0x10] sm:$0xff]   ;;  %s2482_s10 = sshll.u32 %s2558_s6, 4  ;;  %s2483_s10 = int_to_ptr.vmem [resolvable:$false] %s2482_s10 }
  0x76   : > { %485 = vmatprep.subr.bf16.mxu0 %v2361_v7  ;;  %2247 = vmatprep.subr.bf16.mxu1 %v2557_v0  ;;  %v346_v43 = vpack.c.bf16 %v290_v41, %v289_v40  ;;  %v2379_v44 = vld [vmem:[#allocation7 + $0x18] sm:$0xff]   ;;  %v291_v45 = vld [vmem:[%s2773_s11 + $0x80] sm:$0xff]  ;;  %v292_v46 = vld [vmem:[%s2773_s11 + $0x88] sm:$0xff]  ;;  %p2480_p2 = pnand %p2479_p11, %p3232_p0  ;;  %p2485_p5 = scmp.lt.s32.totalorder %s3168_s17, %s2483_s10 }
  0x77   : > { %v2380_v47 = vld [vmem:[#allocation7 + $0x20] sm:$0xff]   ;;  %v347_v48 = vpack.c.bf16 %v292_v46, %v291_v45  ;;  %v2381_v49 = vld [vmem:[#allocation7 + $0x28] sm:$0xff]   ;;  %v293_v50 = vld [vmem:[%s2773_s11 + $0x90] sm:$0xff] }
  0x78   : > { %v294_v51 = vld [vmem:[%s2773_s11 + $0x98] sm:$0xff]  ;;  %v2382_v52 = vld [vmem:[#allocation7 + $0x30] sm:$0xff]   ;;  %v295_v55 = vld [vmem:[%s2773_s11 + $0xa0] sm:$0xff]  ;;  %p2481_p3 = pneg %p2480_p2 }
  0x79   : > { %486 = vmatpush1.bf16.msra.mxu0 %v2363_v8  ;;  %2263 = vmatpush1.bf16.msra.mxu1 %v2377_v39  ;;  %v348_v53 = vpack.c.bf16 %v294_v51, %v293_v50  ;;  %v2383_v54 = vld [vmem:[#allocation7 + $0x38] sm:$0xff]   ;;  %v296_v56 = vld [vmem:[%s2773_s11 + $0xa8] sm:$0xff]  ;;  %v2384_v57 = vld [vmem:[#allocation7 + $0x40] sm:$0xff]  }
  0x7a   : > { %487 = vmatprep.subr.bf16.mxu0 %v2364_v9  ;;  %2248 = vmatprep.subr.bf16.mxu1 %v2557_v0  ;;  %v349_v58 = vpack.c.bf16 %v296_v56, %v295_v55  ;;  %v297_v59 = vld [vmem:[%s2773_s11 + $0xb0] sm:$0xff]  ;;  %v298_v60 = vld [vmem:[%s2773_s11 + $0xb8] sm:$0xff]  ;;  %v2385_v61 = vld [vmem:[#allocation7 + $0x48] sm:$0xff]  }
  0x7b   : > { %v350_v62 = vpack.c.bf16 %v298_v60, %v297_v59  ;;  %v2386_v63 = vld [vmem:[#allocation7 + $0x50] sm:$0xff]   ;;  %v299_v1 = vld [vmem:[%s2773_s11 + $0xc0] sm:$0xff]  ;;  %v300_v2 = vld [vmem:[%s2773_s11 + $0xc8] sm:$0xff] }
  0x7c   : > { %v2387_v3 = vld [vmem:[#allocation7 + $0x58] sm:$0xff]   ;;  %v351_v4 = vpack.c.bf16 %v300_v2, %v299_v1  ;;  %v2388_v5 = vld [vmem:[#allocation7 + $0x60] sm:$0xff]   ;;  %v301_v6 = vld [vmem:[%s2773_s11 + $0xd0] sm:$0xff] }
  0x7d   : > { %488 = vmatpush1.bf16.msra.mxu0 %v2366_v10  ;;  %2264 = vmatpush1.bf16.msra.mxu1 %v2378_v42  ;;  %v302_v7 = vld [vmem:[%s2773_s11 + $0xd8] sm:$0xff]  ;;  %v2389_v8 = vld [vmem:[#allocation7 + $0x68] sm:$0xff]   ;;  %v2390_v10 = vld [vmem:[#allocation7 + $0x70] sm:$0xff]  }
  0x7e   : > { %489 = vmatprep.subr.bf16.mxu0 %v2367_v11  ;;  %2249 = vmatprep.subr.bf16.mxu1 %v2557_v0  ;;  %v352_v9 = vpack.c.bf16 %v302_v7, %v301_v6  ;;  %v303_v11 = vld [vmem:[%s2773_s11 + $0xe0] sm:$0xff]  ;;  %v309_v21 = vld [vmem:[%s2773_s11 + $0x110] sm:$0xff]  ;;  %v322_v40 = vld [vmem:[%s2773_s11 + $0x178] sm:$0xff] }
  0x7f   : > { %v307_v18 = vld [vmem:[%s2773_s11 + $0x100] sm:$0xff]  ;;  %v313_v27 = vld [vmem:[%s2773_s11 + $0x130] sm:$0xff]  ;;  %v326_v46 = vld [vmem:[%s2773_s11 + $0x198] sm:$0xff] }
  0x80   : > { %v311_v24 = vld [vmem:[%s2773_s11 + $0x120] sm:$0xff]  ;;  %v317_v33 = vld [vmem:[%s2773_s11 + $0x150] sm:$0xff]  ;;  %v328_v51 = vld [vmem:[%s2773_s11 + $0x1a8] sm:$0xff] }
  0x81   : > { %490 = vmatpush1.bf16.msra.mxu0 %v2369_v12  ;;  %2265 = vmatpush1.bf16.msra.mxu1 %v2379_v44  ;;  %v304_v12 = vld [vmem:[%s2773_s11 + $0xe8] sm:$0xff]  ;;  %v315_v30 = vld [vmem:[%s2773_s11 + $0x140] sm:$0xff]  ;;  %v325_v45 = vld [vmem:[%s2773_s11 + $0x190] sm:$0xff] }
  0x82   : > { %491 = vmatprep.subr.bf16.mxu0 %v2370_v13  ;;  %2250 = vmatprep.subr.bf16.mxu1 %v2557_v0  ;;  %v2391_v13 = vld [vmem:[#allocation7 + $0x78] sm:$0xff]   ;;  %v319_v36 = vld [vmem:[%s2773_s11 + $0x160] sm:$0xff] }
  0x83   : > { %v327_v50 = vld [vmem:[%s2773_s11 + $0x1a0] sm:$0xff]  ;;  %v330_v59 = vld [vmem:[%s2773_s11 + $0x1b8] sm:$0xff] }
  0x85   : > { %492 = vmatpush1.bf16.msra.mxu0 %v2372_v14  ;;  %2266 = vmatpush1.bf16.msra.mxu1 %v2380_v47  ;;  %v353_v14 = vpack.c.bf16 %v304_v12, %v303_v11  ;;  %v332_v11 = vld [vmem:[%s2773_s11 + $0x1c8] sm:$0xff] }
  0x86   : > { %493 = vmatprep.subr.bf16.mxu0 %v2373_v15  ;;  %2251 = vmatprep.subr.bf16.mxu1 %v2557_v0  ;;  %v305_v15 = vld [vmem:[%s2773_s11 + $0xf0] sm:$0xff] }
  0x89   : > { %494 = vmatpush1.bf16.msra.mxu0 %v2375_v16  ;;  %2267 = vmatpush1.bf16.msra.mxu1 %v2381_v49  ;;  %v306_v16 = vld [vmem:[%s2773_s11 + $0xf8] sm:$0xff] }
  0x8a   : > { %1159 = vmatprep.subr.bf16.mxu0 %v2557_v0  ;;  %2252 = vmatprep.subr.bf16.mxu1 %v2557_v0  ;;  %v354_v17 = vpack.c.bf16 %v306_v16, %v305_v15 }
  0x8c   : > { %512 = vmatmul.mubr.bf16.vlgmr.msra.gmra.mrb[0].mxu0 %v339_v19  ;;  %v308_v19 = vld [vmem:[%s2773_s11 + $0x108] sm:$0xff] }
  0x8d   : > { %521 = vmatprep.mubr.bf16.mxu0 %v2557_v0  ;;  %1160 = vmatpush1.bf16.msra.mxu0 %v2376_v37  ;;  %v355_v20 = vpack.c.bf16 %v308_v19, %v307_v18  ;;  %v320_v37 = vld [vmem:[%s2773_s11 + $0x168] sm:$0xff] }
  0x8e   : > { %1161 = vmatprep.subr.bf16.mxu0 %v2557_v0  ;;  %2268 = vmatpush1.bf16.msra.mxu1 %v2382_v52 }
  0x8f   : > { %2253 = vmatprep.subr.bf16.mxu1 %v2557_v0 }
  0x91   : > { %1162 = vmatpush1.bf16.msra.mxu0 %v2377_v39  ;;  %v321_v39 = vld [vmem:[%s2773_s11 + $0x170] sm:$0xff] }
  0x92   : > { %1163 = vmatprep.subr.bf16.mxu0 %v2557_v0  ;;  %2269 = vmatpush1.bf16.msra.mxu1 %v2383_v54  ;;  %v362_v41 = vpack.c.bf16 %v322_v40, %v321_v39 }
  0x93   : > { %2254 = vmatprep.subr.bf16.mxu1 %v2557_v0 }
  0x94   : > { %522 = vmatmul.mubr.bf16.gmra.mrb[4].mxu0 %v340_v22  ;;  %v310_v22 = vld [vmem:[%s2773_s11 + $0x118] sm:$0xff] }
  0x95   : > { %531 = vmatprep.mubr.bf16.mxu0 %v2557_v0  ;;  %1164 = vmatpush1.bf16.msra.mxu0 %v2378_v42  ;;  %v356_v23 = vpack.c.bf16 %v310_v22, %v309_v21  ;;  %v323_v42 = vld [vmem:[%s2773_s11 + $0x180] sm:$0xff] }
  0x96   : > { %1165 = vmatprep.subr.bf16.mxu0 %v2557_v0  ;;  %2270 = vmatpush1.bf16.msra.mxu1 %v2384_v57 }
  0x97   : > { %2255 = vmatprep.subr.bf16.mxu1 %v2557_v0 }
  0x99   : > { %1166 = vmatpush1.bf16.msra.mxu0 %v2379_v44 }
  0x9a   : > { %1167 = vmatprep.subr.bf16.mxu0 %v2557_v0  ;;  %2271 = vmatpush1.bf16.msra.mxu1 %v2385_v61 }
  0x9b   : > { %2256 = vmatprep.subr.bf16.mxu1 %v2557_v0 }
  0x9c   : > { %532 = vmatmul.mubr.bf16.gmra.mrb[8].mxu0 %v341_v25  ;;  %v312_v25 = vld [vmem:[%s2773_s11 + $0x128] sm:$0xff] }
  0x9d   : > { %541 = vmatprep.mubr.bf16.mxu0 %v2557_v0  ;;  %1168 = vmatpush1.bf16.msra.mxu0 %v2380_v47  ;;  %v357_v26 = vpack.c.bf16 %v312_v25, %v311_v24  ;;  %v364_v47 = vpack.c.bf16 %v326_v46, %v325_v45  ;;  %v336_v45 = vld [vmem:[%s2773_s11 + $0x1e8] sm:$0xff] }
  0x9e   : > { %1169 = vmatprep.subr.bf16.mxu0 %v2557_v0  ;;  %2272 = vmatpush1.bf16.msra.mxu1 %v2386_v63 }
  0x9f   : > { %2257 = vmatprep.subr.bf16.mxu1 %v2557_v0 }
  0xa1   : > { %1170 = vmatpush1.bf16.msra.mxu0 %v2381_v49 }
  0xa2   : > { %1171 = vmatprep.subr.bf16.mxu0 %v2557_v0  ;;  %2273 = vmatpush1.bf16.msra.mxu1 %v2387_v3 }
  0xa3   : > { %2258 = vmatprep.subr.bf16.mxu1 %v2557_v0 }
  0xa4   : > { %542 = vmatmul.mubr.bf16.gmra.mrb[12].mxu0 %v342_v28  ;;  %v314_v28 = vld [vmem:[%s2773_s11 + $0x138] sm:$0xff] }
  0xa5   : > { %551 = vmatprep.mubr.bf16.mxu0 %v2557_v0  ;;  %1172 = vmatpush1.bf16.msra.mxu0 %v2382_v52  ;;  %v358_v29 = vpack.c.bf16 %v314_v28, %v313_v27  ;;  %v365_v52 = vpack.c.bf16 %v328_v51, %v327_v50  ;;  %v333_v27 = vld [vmem:[%s2773_s11 + $0x1d0] sm:$0xff]  ;;  %v334_v28 = vld [vmem:[%s2773_s11 + $0x1d8] sm:$0xff] }
  0xa6   : > { %1173 = vmatprep.subr.bf16.mxu0 %v2557_v0  ;;  %2274 = vmatpush1.bf16.msra.mxu1 %v2388_v5 }
  0xa7   : > { %2259 = vmatprep.subr.bf16.mxu1 %v2557_v0 }
  0xa9   : > { %1174 = vmatpush1.bf16.msra.mxu0 %v2383_v54  ;;  %v387_v54 = vld [vmem:[%s3215_s2] sm:$0x3] }
  0xaa   : > { %1175 = vmatprep.subr.bf16.mxu0 %v2557_v0  ;;  %2275 = vmatpush1.bf16.msra.mxu1 %v2389_v8 }
  0xab   : > { %2260 = vmatprep.subr.bf16.mxu1 %v2557_v0 }
  0xac   : > { %552 = vmatmul.mubr.bf16.gmra.mrb[16].mxu0 %v343_v31  ;;  %v316_v31 = vld [vmem:[%s2773_s11 + $0x148] sm:$0xff] }
  0xad   : > { %561 = vmatprep.mubr.bf16.mxu0 %v2557_v0  ;;  %1176 = vmatpush1.bf16.msra.mxu0 %v2384_v57  ;;  %v359_v32 = vpack.c.bf16 %v316_v31, %v315_v30 }
  0xae   : > { %1177 = vmatprep.subr.bf16.mxu0 %v2557_v0  ;;  %2276 = vmatpush1.bf16.msra.mxu1 %v2390_v10 }
  0xaf   : > { %2261 = vmatprep.subr.bf16.mxu1 %v2557_v0 }
  0xb1   : > { %1178 = vmatpush1.bf16.msra.mxu0 %v2385_v61 }
  0xb2   : > { %1179 = vmatprep.subr.bf16.mxu0 %v2557_v0  ;;  %2277 = vmatpush1.bf16.msra.mxu1 %v2391_v13 }
  0xb4   : > { %562 = vmatmul.mubr.bf16.gmra.mrb[20].mxu0 %v344_v34  ;;  %v318_v34 = vld [vmem:[%s2773_s11 + $0x158] sm:$0xff] }
  0xb5   : > { %571 = vmatprep.mubr.bf16.mxu0 %v2557_v0  ;;  %1180 = vmatpush1.bf16.msra.mxu0 %v2386_v63  ;;  %v360_v35 = vpack.c.bf16 %v318_v34, %v317_v33  ;;  %v368_v34 = vpack.c.bf16 %v334_v28, %v333_v27 }
  0xb6   : > { %1181 = vmatprep.subr.bf16.mxu0 %v2557_v0 }
  0xb9   : > { %1182 = vmatpush1.bf16.msra.mxu0 %v2387_v3 }
  0xba   : > { %1183 = vmatprep.subr.bf16.mxu0 %v2557_v0 }
  0xbc   : > { %572 = vmatmul.mubr.bf16.gmra.mrb[24].mxu0 %v345_v38  ;;  %v361_v38 = vpack.c.bf16 %v320_v37, %v319_v36 }
  0xbd   : > { %581 = vmatprep.mubr.bf16.mxu0 %v2557_v0  ;;  %1184 = vmatpush1.bf16.msra.mxu0 %v2388_v5 }
  0xbe   : > { %1185 = vmatprep.subr.bf16.mxu0 %v2557_v0 }
  0xc1   : > { %1186 = vmatpush1.bf16.msra.mxu0 %v2389_v8 }
  0xc2   : > { %1187 = vmatprep.subr.bf16.mxu0 %v2557_v0 }
  0xc4   : > { %582 = vmatmul.mubr.bf16.gmra.mrb[28].mxu0 %v346_v43  ;;  %v324_v43 = vld [vmem:[%s2773_s11 + $0x188] sm:$0xff] }
  0xc5   : > { %591 = vmatprep.mubr.bf16.mxu0 %v2557_v0  ;;  %1188 = vmatpush1.bf16.msra.mxu0 %v2390_v10  ;;  %v363_v44 = vpack.c.bf16 %v324_v43, %v323_v42  ;;  %v331_v10 = vld [vmem:[%s2773_s11 + $0x1c0] sm:$0xff] }
  0xc6   : > { %1189 = vmatprep.subr.bf16.mxu0 %v2557_v0 }
  0xc9   : > { %1190 = vmatpush1.bf16.msra.mxu0 %v2391_v13 }
  0xcc   : > { %592 = vmatmul.mubr.bf16.gmra.mrb[32].mxu0 %v347_v48  ;;  %v389_v48 = vlaneseq }
  0xcd   : > { %601 = vmatprep.mubr.bf16.mxu0 %v2557_v0 }
  0xce   : > { %v390_v49 = vshrl.u32 %v389_v48, 7 }
  0xd0   : > { %v395_v55 = vsub.s32 1, %v390_v49 }
  0xd2   : > { %v2901_v57 = vrot.slane %v387_v54, %v395_v55 }
  0xd4   : > { %602 = vmatmul.mubr.bf16.gmra.mrb[36].mxu0 %v348_v53  ;;  %v391_v53 = vsub.s32 0, %v390_v49 }
  0xd5   : > { %611 = vmatprep.mubr.bf16.mxu0 %v2557_v0 }
  0xd6   : > { %v2899_v56 = vrot.slane %v387_v54, %v391_v53 }
  0xdc   : > { %612 = vmatmul.mubr.bf16.gmra.mrb[40].mxu0 %v349_v58  ;;  %v329_v58 = vld [vmem:[%s2773_s11 + $0x1b0] sm:$0xff] }
  0xdd   : > { %621 = vmatprep.mubr.bf16.mxu0 %v2557_v0  ;;  %v366_v63 = vpack.c.bf16 %v330_v59, %v329_v58 }
  0xe4   : > { %622 = vmatmul.mubr.bf16.gmra.mrb[44].mxu0 %v350_v62 }
  0xe5   : > { %631 = vmatprep.mubr.bf16.mxu0 %v2557_v0 }
  0xec   : > { %632 = vmatmul.mubr.bf16.gmra.mrb[48].mxu0 %v351_v4 }
  0xed   : > { %641 = vmatprep.mubr.bf16.mxu0 %v2557_v0 }
  0xf4   : > { %642 = vmatmul.mubr.bf16.gmra.mrb[52].mxu0 %v352_v9 }
  0xf5   : > { %651 = vmatprep.mubr.bf16.mxu0 %v2557_v0 }
  0xfc   : > { %652 = vmatmul.mubr.bf16.gmra.mrb[56].mxu0 %v353_v14 }
  0xfd   : > { %661 = vmatprep.mubr.bf16.mxu0 %v2557_v0 }
 0x104   : > { %662 = vmatmul.mubr.bf16.gmra.mrb[60].mxu0 %v354_v17  ;;  %v367_v17 = vpack.c.bf16 %v332_v11, %v331_v10 }
 0x105   : > { %671 = vmatprep.mubr.bf16.mxu0 %v2557_v0 }
 0x10c   : > { %672 = vmatmul.mubr.bf16.gmra.mrb[64].mxu0 %v355_v20 }
 0x10d   : > { %681 = vmatprep.mubr.bf16.mxu0 %v2557_v0 }
 0x114   : > { %682 = vmatmul.mubr.bf16.gmra.mrb[68].mxu0 %v356_v23 }
 0x115   : > { %691 = vmatprep.mubr.bf16.mxu0 %v2557_v0 }
 0x11c   : > { %692 = vmatmul.mubr.bf16.gmra.mrb[72].mxu0 %v357_v26 }
 0x11d   : > { %701 = vmatprep.mubr.bf16.mxu0 %v2557_v0 }
 0x124   : > { %702 = vmatmul.mubr.bf16.gmra.mrb[76].mxu0 %v358_v29 }
 0x125   : > { %711 = vmatprep.mubr.bf16.mxu0 %v2557_v0 }
 0x12c   : > { %712 = vmatmul.mubr.bf16.gmra.mrb[80].mxu0 %v359_v32 }
 0x12d   : > { %721 = vmatprep.mubr.bf16.mxu0 %v2557_v0 }
 0x134   : > { %722 = vmatmul.mubr.bf16.gmra.mrb[84].mxu0 %v360_v35 }
 0x135   : > { %731 = vmatprep.mubr.bf16.mxu0 %v2557_v0 }
 0x13c   : > { %732 = vmatmul.mubr.bf16.gmra.mrb[88].mxu0 %v361_v38 }
 0x13d   : > { %741 = vmatprep.mubr.bf16.mxu0 %v2557_v0 }
 0x144   : > { %742 = vmatmul.mubr.bf16.gmra.mrb[92].mxu0 %v362_v41 }
 0x145   : > { %751 = vmatprep.mubr.bf16.mxu0 %v2557_v0 }
 0x14c   : > { %752 = vmatmul.mubr.bf16.gmra.mrb[96].mxu0 %v363_v44  ;;  %v335_v44 = vld [vmem:[%s2773_s11 + $0x1e0] sm:$0xff] }
 0x14d   : > { %761 = vmatprep.mubr.bf16.mxu0 %v2557_v0  ;;  %v369_v51 = vpack.c.bf16 %v336_v45, %v335_v44 }
 0x154   : > { %762 = vmatmul.mubr.bf16.gmra.mrb[100].mxu0 %v364_v47 }
 0x155   : > { %771 = vmatprep.mubr.bf16.mxu0 %v2557_v0 }
 0x15c   : > { %772 = vmatmul.mubr.bf16.gmra.mrb[104].mxu0 %v365_v52 }
 0x15d   : > { %781 = vmatprep.mubr.bf16.mxu0 %v2557_v0 }
 0x15f   : > { %v513_v60 = vpop.f32.mrb[0].mxu0 }
 0x160   : > { %v514_v61 = vadd.f32 %v513_v60, %v2899_v56  ;;  %v515_v62 = vpop.f32.mrb[1].mxu0 }
 0x161   : > { %v516_v1 = vadd.f32 %v515_v62, %v2901_v57  ;;  %v517_v2 = vpop.f32.mrb[2].mxu0 }
 0x162   : > { %v518_v3 = vadd.f32 %v517_v2, %v2899_v56  ;;  %v519_v4 = vpop.f32.mrb[3].mxu0  ;;  %v832_v6 = vmax.f32 %v514_v61, 0.0 }
 0x163   : > { %v520_v5 = vadd.f32 %v519_v4, %v2901_v57  ;;  %v833_v8 = vmax.f32 %v516_v1, 0.0  ;;  %v338_v1 = vld [vmem:[%s2773_s11 + $0x1f8] sm:$0xff] }
 0x164   : > { %v834_v7 = vmax.f32 %v518_v3, 0.0  ;;  %782 = vmatmul.mubr.bf16.gmra.mrb[108].mxu0 %v366_v63  ;;  %v337_v63 = vld [vmem:[%s2773_s11 + $0x1f0] sm:$0xff]  ;;  %s2484_s11 = scalar_lea.vmem %s2483_s10, 8192 }
 0x165   : > { %v835_v9 = vmax.f32 %v520_v5, 0.0  ;;  %791 = vmatprep.mubr.bf16.mxu0 %v2557_v0  ;;  %p2486_p9 = scmp.lt.s32.totalorder %s2484_s11, %s2478_s9 }
 0x166   : > { %v2913_v12 = vpack.c.bf16 %v834_v7, %v832_v6  ;;  %v370_v7 = vpack.c.bf16 %v338_v1, %v337_v63 }
 0x167   : > { %v2915_v13 = vpack.c.bf16 %v835_v9, %v833_v8  ;;  %v523_v14 = vpop.f32.mrb[4].mxu0  ;;  %p2487_p12 = por %p2486_p9, %p2485_p5 }
 0x168   : > { %v524_v15 = vadd.f32 %v523_v14, %v2899_v56  ;;  %v525_v16 = vpop.f32.mrb[5].mxu0 }
 0x169   : > { %v526_v18 = vadd.f32 %v525_v16, %v2901_v57  ;;  %v527_v19 = vpop.f32.mrb[6].mxu0  ;;  %p2488_p1 = pnand %p2487_p12, %p2481_p3 }
 0x16a   : > { %v528_v20 = vadd.f32 %v527_v19, %v2899_v56  ;;  %v529_v21 = vpop.f32.mrb[7].mxu0  ;;  %v836_v23 = vmax.f32 %v524_v15, 0.0 }
 0x16b   : > { %v530_v22 = vadd.f32 %v529_v21, %v2901_v57  ;;  %v837_v25 = vmax.f32 %v526_v18, 0.0 }
 0x16c   : > { %v838_v24 = vmax.f32 %v528_v20, 0.0  ;;  %792 = vmatmul.mubr.bf16.gmra.mrb[112].mxu0 %v367_v17 }
 0x16d   : > { %v839_v26 = vmax.f32 %v530_v22, 0.0  ;;  %801 = vmatprep.mubr.bf16.mxu0 %v2557_v0 }
 0x16e   : > { %v2924_v29 = vpack.c.bf16 %v838_v24, %v836_v23 }
 0x16f   : > { %v2926_v30 = vpack.c.bf16 %v839_v26, %v837_v25  ;;  %v533_v31 = vpop.f32.mrb[8].mxu0 }
 0x170   : > { %v534_v32 = vadd.f32 %v533_v31, %v2899_v56  ;;  %v535_v33 = vpop.f32.mrb[9].mxu0 }
 0x171   : > { %v536_v35 = vadd.f32 %v535_v33, %v2901_v57  ;;  %v537_v36 = vpop.f32.mrb[10].mxu0 }
 0x172   : > { %v538_v37 = vadd.f32 %v537_v36, %v2899_v56  ;;  %v539_v38 = vpop.f32.mrb[11].mxu0  ;;  %v840_v40 = vmax.f32 %v534_v32, 0.0 }
 0x173   : > { %v540_v39 = vadd.f32 %v539_v38, %v2901_v57  ;;  %v841_v42 = vmax.f32 %v536_v35, 0.0 }
 0x174   : > { %v842_v41 = vmax.f32 %v538_v37, 0.0  ;;  %802 = vmatmul.mubr.bf16.gmra.mrb[116].mxu0 %v368_v34 }
 0x175   : > { %v843_v43 = vmax.f32 %v540_v39, 0.0  ;;  %811 = vmatprep.mubr.bf16.mxu0 %v2557_v0 }
 0x176   : > { %v964_v46 = vpack.c.bf16 %v842_v41, %v840_v40 }
 0x177   : > { %v543_v47 = vpop.f32.mrb[12].mxu0  ;;  %v965_v48 = vpack.c.bf16 %v843_v43, %v841_v42 }
 0x178   : > { %v544_v49 = vadd.f32 %v543_v47, %v2899_v56  ;;  %v545_v50 = vpop.f32.mrb[13].mxu0 }
 0x179   : > { %v546_v52 = vadd.f32 %v545_v50, %v2901_v57  ;;  %v547_v53 = vpop.f32.mrb[14].mxu0  ;;  %1207 = vmatprep.mubr.bf16.mxu1 %v965_v48 }
 0x17a   : > { %v548_v54 = vadd.f32 %v547_v53, %v2899_v56  ;;  %v549_v55 = vpop.f32.mrb[15].mxu0  ;;  %1208 = vmatmul.mubr.bf16.vlgmr.msra.gmra.mrb[0].mxu1 %v964_v46  ;;  %v844_v59 = vmax.f32 %v544_v49, 0.0 }
 0x17b   : > { %v550_v58 = vadd.f32 %v549_v55, %v2901_v57  ;;  %v845_v61 = vmax.f32 %v546_v52, 0.0 }
 0x17c   : > { %v846_v60 = vmax.f32 %v548_v54, 0.0  ;;  %812 = vmatmul.mubr.bf16.gmra.mrb[120].mxu0 %v369_v51 }
 0x17d   : > { %v847_v62 = vmax.f32 %v550_v58, 0.0  ;;  %821 = vmatprep.mubr.bf16.mxu0 %v2557_v0 }
 0x17e   : > { %v966_v2 = vpack.c.bf16 %v846_v60, %v844_v59 }
 0x17f   : > { %v967_v3 = vpack.c.bf16 %v847_v62, %v845_v61  ;;  %v553_v4 = vpop.f32.mrb[16].mxu0 }
 0x180   : > { %v554_v5 = vadd.f32 %v553_v4, %v2899_v56  ;;  %v555_v6 = vpop.f32.mrb[17].mxu0 }
 0x181   : > { %v556_v8 = vadd.f32 %v555_v6, %v2901_v57  ;;  %v557_v9 = vpop.f32.mrb[18].mxu0  ;;  %1215 = vmatprep.mubr.bf16.mxu1 %v967_v3 }
 0x182   : > { %v558_v10 = vadd.f32 %v557_v9, %v2899_v56  ;;  %v559_v11 = vpop.f32.mrb[19].mxu0  ;;  %1216 = vmatmul.mubr.bf16.gmra.mrb[4].mxu1 %v966_v2  ;;  %v848_v0 = vmax.f32 %v554_v5, 0.0 }
 0x183   : > { %v560_v14 = vadd.f32 %v559_v11, %v2901_v57  ;;  %v849_v16 = vmax.f32 %v556_v8, 0.0 }
 0x184   : > { %v850_v15 = vmax.f32 %v558_v10, 0.0  ;;  %822 = vmatmul.mubr.bf16.gmra.mrb[124].mxu0 %v370_v7 }
 0x185   : > { %v851_v17 = vmax.f32 %v560_v14, 0.0  ;;  %1191 = vmatprep.mubr.bf16.mxu0 %v2915_v13 }
 0x186   : > { %v968_v18 = vpack.c.bf16 %v850_v15, %v848_v0 }
 0x187   : > { %v969_v19 = vpack.c.bf16 %v851_v17, %v849_v16  ;;  %v563_v20 = vpop.f32.mrb[20].mxu0 }
 0x188   : > { %v564_v21 = vadd.f32 %v563_v20, %v2899_v56  ;;  %v565_v22 = vpop.f32.mrb[21].mxu0 }
 0x189   : > { %v566_v23 = vadd.f32 %v565_v22, %v2901_v57  ;;  %v567_v24 = vpop.f32.mrb[22].mxu0  ;;  %1223 = vmatprep.mubr.bf16.mxu1 %v969_v19 }
 0x18a   : > { %v568_v25 = vadd.f32 %v567_v24, %v2899_v56  ;;  %v569_v26 = vpop.f32.mrb[23].mxu0  ;;  %1224 = vmatmul.mubr.bf16.gmra.mrb[8].mxu1 %v968_v18  ;;  %v852_v28 = vmax.f32 %v564_v21, 0.0 }
 0x18b   : > { %v570_v27 = vadd.f32 %v569_v26, %v2901_v57  ;;  %v853_v13 = vmax.f32 %v566_v23, 0.0 }
 0x18c   : > { %v854_v31 = vmax.f32 %v568_v25, 0.0  ;;  %1192 = vmatmul.mubr.bf16.vlgmr.msra.gmra.mrb[128].mxu0 %v2913_v12 }
 0x18d   : > { %v855_v32 = vmax.f32 %v570_v27, 0.0  ;;  %1199 = vmatprep.mubr.bf16.mxu0 %v2926_v30 }
 0x18e   : > { %v970_v33 = vpack.c.bf16 %v854_v31, %v852_v28 }
 0x18f   : > { %v971_v34 = vpack.c.bf16 %v855_v32, %v853_v13  ;;  %v573_v35 = vpop.f32.mrb[24].mxu0 }
 0x190   : > { %v574_v36 = vadd.f32 %v573_v35, %v2899_v56  ;;  %v575_v37 = vpop.f32.mrb[25].mxu0 }
 0x191   : > { %v576_v38 = vadd.f32 %v575_v37, %v2901_v57  ;;  %v577_v39 = vpop.f32.mrb[26].mxu0  ;;  %1231 = vmatprep.mubr.bf16.mxu1 %v971_v34 }
 0x192   : > { %v578_v40 = vadd.f32 %v577_v39, %v2899_v56  ;;  %v579_v41 = vpop.f32.mrb[27].mxu0  ;;  %1232 = vmatmul.mubr.bf16.gmra.mrb[12].mxu1 %v970_v33  ;;  %v856_v42 = vmax.f32 %v574_v36, 0.0 }
 0x193   : > { %v580_v12 = vadd.f32 %v579_v41, %v2901_v57  ;;  %v857_v30 = vmax.f32 %v576_v38, 0.0 }
 0x194   : > { %v858_v43 = vmax.f32 %v578_v40, 0.0  ;;  %1200 = vmatmul.mubr.bf16.gmra.mrb[132].mxu0 %v2924_v29 }
 0x195   : > { %v859_v44 = vmax.f32 %v580_v12, 0.0 }
 0x196   : > { %v972_v45 = vpack.c.bf16 %v858_v43, %v856_v42 }
 0x197   : > { %v973_v46 = vpack.c.bf16 %v859_v44, %v857_v30  ;;  %v583_v47 = vpop.f32.mrb[28].mxu0 }
 0x198   : > { %v584_v48 = vadd.f32 %v583_v47, %v2899_v56  ;;  %v585_v49 = vpop.f32.mrb[29].mxu0 }
 0x199   : > { %v586_v50 = vadd.f32 %v585_v49, %v2901_v57  ;;  %v587_v51 = vpop.f32.mrb[30].mxu0  ;;  %1239 = vmatprep.mubr.bf16.mxu1 %v973_v46 }
 0x19a   : > { %v588_v52 = vadd.f32 %v587_v51, %v2899_v56  ;;  %v589_v53 = vpop.f32.mrb[31].mxu0  ;;  %1240 = vmatmul.mubr.bf16.gmra.mrb[16].mxu1 %v972_v45  ;;  %v860_v55 = vmax.f32 %v584_v48, 0.0 }
 0x19b   : > { %v590_v54 = vadd.f32 %v589_v53, %v2901_v57  ;;  %v861_v58 = vmax.f32 %v586_v50, 0.0 }
 0x19c   : > { %v862_v29 = vmax.f32 %v588_v52, 0.0 }
 0x19d   : > { %v863_v59 = vmax.f32 %v590_v54, 0.0 }
 0x19e   : > { %v974_v60 = vpack.c.bf16 %v862_v29, %v860_v55 }
 0x19f   : > { %v975_v61 = vpack.c.bf16 %v863_v59, %v861_v58  ;;  %v593_v62 = vpop.f32.mrb[32].mxu0 }
 0x1a0   : > { %v594_v63 = vadd.f32 %v593_v62, %v2899_v56  ;;  %v595_v1 = vpop.f32.mrb[33].mxu0 }
 0x1a1   : > { %v596_v2 = vadd.f32 %v595_v1, %v2901_v57  ;;  %v597_v3 = vpop.f32.mrb[34].mxu0  ;;  %1247 = vmatprep.mubr.bf16.mxu1 %v975_v61 }
 0x1a2   : > { %v598_v4 = vadd.f32 %v597_v3, %v2899_v56  ;;  %v599_v5 = vpop.f32.mrb[35].mxu0  ;;  %1248 = vmatmul.mubr.bf16.gmra.mrb[20].mxu1 %v974_v60  ;;  %v864_v7 = vmax.f32 %v594_v63, 0.0 }
 0x1a3   : > { %v600_v6 = vadd.f32 %v599_v5, %v2901_v57  ;;  %v865_v9 = vmax.f32 %v596_v2, 0.0 }
 0x1a4   : > { %v866_v8 = vmax.f32 %v598_v4, 0.0 }
 0x1a5   : > { %v867_v10 = vmax.f32 %v600_v6, 0.0 }
 0x1a6   : > { %v976_v11 = vpack.c.bf16 %v866_v8, %v864_v7 }
 0x1a7   : > { %v977_v14 = vpack.c.bf16 %v867_v10, %v865_v9  ;;  %v603_v0 = vpop.f32.mrb[36].mxu0 }
 0x1a8   : > { %v604_v15 = vadd.f32 %v603_v0, %v2899_v56  ;;  %v605_v16 = vpop.f32.mrb[37].mxu0 }
 0x1a9   : > { %v606_v17 = vadd.f32 %v605_v16, %v2901_v57  ;;  %v607_v18 = vpop.f32.mrb[38].mxu0  ;;  %1255 = vmatprep.mubr.bf16.mxu1 %v977_v14 }
 0x1aa   : > { %v608_v19 = vadd.f32 %v607_v18, %v2899_v56  ;;  %v609_v20 = vpop.f32.mrb[39].mxu0  ;;  %1256 = vmatmul.mubr.bf16.gmra.mrb[24].mxu1 %v976_v11  ;;  %v868_v22 = vmax.f32 %v604_v15, 0.0 }
 0x1ab   : > { %v610_v21 = vadd.f32 %v609_v20, %v2901_v57  ;;  %v869_v24 = vmax.f32 %v606_v17, 0.0 }
 0x1ac   : > { %v870_v23 = vmax.f32 %v608_v19, 0.0 }
 0x1ad   : > { %v871_v25 = vmax.f32 %v610_v21, 0.0 }
 0x1ae   : > { %v978_v26 = vpack.c.bf16 %v870_v23, %v868_v22 }
 0x1af   : > { %v979_v27 = vpack.c.bf16 %v871_v25, %v869_v24  ;;  %v613_v28 = vpop.f32.mrb[40].mxu0 }
 0x1b0   : > { %v614_v31 = vadd.f32 %v613_v28, %v2899_v56  ;;  %v615_v13 = vpop.f32.mrb[41].mxu0 }
 0x1b1   : > { %v616_v32 = vadd.f32 %v615_v13, %v2901_v57  ;;  %v617_v33 = vpop.f32.mrb[42].mxu0  ;;  %1263 = vmatprep.mubr.bf16.mxu1 %v979_v27 }
 0x1b2   : > { %v618_v34 = vadd.f32 %v617_v33, %v2899_v56  ;;  %v619_v35 = vpop.f32.mrb[43].mxu0  ;;  %1264 = vmatmul.mubr.bf16.gmra.mrb[28].mxu1 %v978_v26  ;;  %v872_v37 = vmax.f32 %v614_v31, 0.0 }
 0x1b3   : > { %v620_v36 = vadd.f32 %v619_v35, %v2901_v57  ;;  %v873_v39 = vmax.f32 %v616_v32, 0.0 }
 0x1b4   : > { %v874_v38 = vmax.f32 %v618_v34, 0.0 }
 0x1b5   : > { %v875_v40 = vmax.f32 %v620_v36, 0.0 }
 0x1b6   : > { %v980_v41 = vpack.c.bf16 %v874_v38, %v872_v37 }
 0x1b7   : > { %v981_v12 = vpack.c.bf16 %v875_v40, %v873_v39  ;;  %v623_v42 = vpop.f32.mrb[44].mxu0 }
 0x1b8   : > { %v624_v43 = vadd.f32 %v623_v42, %v2899_v56  ;;  %v625_v30 = vpop.f32.mrb[45].mxu0 }
 0x1b9   : > { %v626_v44 = vadd.f32 %v625_v30, %v2901_v57  ;;  %v627_v45 = vpop.f32.mrb[46].mxu0  ;;  %1271 = vmatprep.mubr.bf16.mxu1 %v981_v12 }
 0x1ba   : > { %v628_v46 = vadd.f32 %v627_v45, %v2899_v56  ;;  %v629_v47 = vpop.f32.mrb[47].mxu0  ;;  %1272 = vmatmul.mubr.bf16.gmra.mrb[32].mxu1 %v980_v41  ;;  %v876_v49 = vmax.f32 %v624_v43, 0.0 }
 0x1bb   : > { %v630_v48 = vadd.f32 %v629_v47, %v2901_v57  ;;  %v877_v51 = vmax.f32 %v626_v44, 0.0 }
 0x1bc   : > { %v878_v50 = vmax.f32 %v628_v46, 0.0 }
 0x1bd   : > { %v879_v52 = vmax.f32 %v630_v48, 0.0 }
 0x1be   : > { %v982_v53 = vpack.c.bf16 %v878_v50, %v876_v49 }
 0x1bf   : > { %v983_v54 = vpack.c.bf16 %v879_v52, %v877_v51  ;;  %v633_v55 = vpop.f32.mrb[48].mxu0 }
 0x1c0   : > { %v634_v29 = vadd.f32 %v633_v55, %v2899_v56  ;;  %v635_v58 = vpop.f32.mrb[49].mxu0 }
 0x1c1   : > { %v636_v59 = vadd.f32 %v635_v58, %v2901_v57  ;;  %v637_v60 = vpop.f32.mrb[50].mxu0  ;;  %1279 = vmatprep.mubr.bf16.mxu1 %v983_v54 }
 0x1c2   : > { %v638_v61 = vadd.f32 %v637_v60, %v2899_v56  ;;  %v639_v62 = vpop.f32.mrb[51].mxu0  ;;  %1280 = vmatmul.mubr.bf16.gmra.mrb[36].mxu1 %v982_v53  ;;  %v880_v1 = vmax.f32 %v634_v29, 0.0 }
 0x1c3   : > { %v640_v63 = vadd.f32 %v639_v62, %v2901_v57  ;;  %v881_v3 = vmax.f32 %v636_v59, 0.0 }
 0x1c4   : > { %v882_v2 = vmax.f32 %v638_v61, 0.0 }
 0x1c5   : > { %v883_v4 = vmax.f32 %v640_v63, 0.0 }
 0x1c6   : > { %v984_v5 = vpack.c.bf16 %v882_v2, %v880_v1 }
 0x1c7   : > { %v985_v6 = vpack.c.bf16 %v883_v4, %v881_v3  ;;  %v643_v7 = vpop.f32.mrb[52].mxu0 }
 0x1c8   : > { %v644_v8 = vadd.f32 %v643_v7, %v2899_v56  ;;  %v645_v9 = vpop.f32.mrb[53].mxu0 }
 0x1c9   : > { %v646_v10 = vadd.f32 %v645_v9, %v2901_v57  ;;  %v647_v11 = vpop.f32.mrb[54].mxu0  ;;  %1287 = vmatprep.mubr.bf16.mxu1 %v985_v6 }
 0x1ca   : > { %v648_v14 = vadd.f32 %v647_v11, %v2899_v56  ;;  %v649_v0 = vpop.f32.mrb[55].mxu0  ;;  %1288 = vmatmul.mubr.bf16.gmra.mrb[40].mxu1 %v984_v5  ;;  %v884_v16 = vmax.f32 %v644_v8, 0.0 }
 0x1cb   : > { %v650_v15 = vadd.f32 %v649_v0, %v2901_v57  ;;  %v885_v18 = vmax.f32 %v646_v10, 0.0 }
 0x1cc   : > { %v886_v17 = vmax.f32 %v648_v14, 0.0 }
 0x1cd   : > { %v887_v19 = vmax.f32 %v650_v15, 0.0 }
 0x1ce   : > { %v986_v20 = vpack.c.bf16 %v886_v17, %v884_v16 }
 0x1cf   : > { %v987_v21 = vpack.c.bf16 %v887_v19, %v885_v18  ;;  %v653_v22 = vpop.f32.mrb[56].mxu0 }
 0x1d0   : > { %v654_v23 = vadd.f32 %v653_v22, %v2899_v56  ;;  %v655_v24 = vpop.f32.mrb[57].mxu0 }
 0x1d1   : > { %v656_v25 = vadd.f32 %v655_v24, %v2901_v57  ;;  %v657_v26 = vpop.f32.mrb[58].mxu0  ;;  %1295 = vmatprep.mubr.bf16.mxu1 %v987_v21 }
 0x1d2   : > { %v658_v27 = vadd.f32 %v657_v26, %v2899_v56  ;;  %v659_v28 = vpop.f32.mrb[59].mxu0  ;;  %1296 = vmatmul.mubr.bf16.gmra.mrb[44].mxu1 %v986_v20  ;;  %v888_v13 = vmax.f32 %v654_v23, 0.0 }
 0x1d3   : > { %v660_v31 = vadd.f32 %v659_v28, %v2901_v57  ;;  %v889_v33 = vmax.f32 %v656_v25, 0.0 }
 0x1d4   : > { %v890_v32 = vmax.f32 %v658_v27, 0.0 }
 0x1d5   : > { %v891_v34 = vmax.f32 %v660_v31, 0.0 }
 0x1d6   : > { %v988_v35 = vpack.c.bf16 %v890_v32, %v888_v13 }
 0x1d7   : > { %v989_v36 = vpack.c.bf16 %v891_v34, %v889_v33  ;;  %v663_v37 = vpop.f32.mrb[60].mxu0 }
 0x1d8   : > { %v664_v38 = vadd.f32 %v663_v37, %v2899_v56  ;;  %v665_v39 = vpop.f32.mrb[61].mxu0 }
 0x1d9   : > { %v666_v40 = vadd.f32 %v665_v39, %v2901_v57  ;;  %v667_v41 = vpop.f32.mrb[62].mxu0  ;;  %1303 = vmatprep.mubr.bf16.mxu1 %v989_v36 }
 0x1da   : > { %v668_v12 = vadd.f32 %v667_v41, %v2899_v56  ;;  %v669_v42 = vpop.f32.mrb[63].mxu0  ;;  %1304 = vmatmul.mubr.bf16.gmra.mrb[48].mxu1 %v988_v35  ;;  %v892_v30 = vmax.f32 %v664_v38, 0.0 }
 0x1db   : > { %v670_v43 = vadd.f32 %v669_v42, %v2901_v57  ;;  %v893_v45 = vmax.f32 %v666_v40, 0.0 }
 0x1dc   : > { %v894_v44 = vmax.f32 %v668_v12, 0.0 }
 0x1dd   : > { %v895_v46 = vmax.f32 %v670_v43, 0.0 }
 0x1de   : > { %v990_v47 = vpack.c.bf16 %v894_v44, %v892_v30 }
 0x1df   : > { %v991_v48 = vpack.c.bf16 %v895_v46, %v893_v45  ;;  %v673_v49 = vpop.f32.mrb[64].mxu0 }
 0x1e0   : > { %v674_v50 = vadd.f32 %v673_v49, %v2899_v56  ;;  %v675_v51 = vpop.f32.mrb[65].mxu0 }
 0x1e1   : > { %v676_v52 = vadd.f32 %v675_v51, %v2901_v57  ;;  %v677_v53 = vpop.f32.mrb[66].mxu0  ;;  %1311 = vmatprep.mubr.bf16.mxu1 %v991_v48 }
 0x1e2   : > { %v678_v54 = vadd.f32 %v677_v53, %v2899_v56  ;;  %v679_v55 = vpop.f32.mrb[67].mxu0  ;;  %1312 = vmatmul.mubr.bf16.gmra.mrb[52].mxu1 %v990_v47  ;;  %v896_v58 = vmax.f32 %v674_v50, 0.0 }
 0x1e3   : > { %v680_v29 = vadd.f32 %v679_v55, %v2901_v57  ;;  %v897_v60 = vmax.f32 %v676_v52, 0.0 }
 0x1e4   : > { %v898_v59 = vmax.f32 %v678_v54, 0.0 }
 0x1e5   : > { %v899_v61 = vmax.f32 %v680_v29, 0.0 }
 0x1e6   : > { %v992_v62 = vpack.c.bf16 %v898_v59, %v896_v58 }
 0x1e7   : > { %v993_v63 = vpack.c.bf16 %v899_v61, %v897_v60  ;;  %v683_v1 = vpop.f32.mrb[68].mxu0 }
 0x1e8   : > { %v684_v2 = vadd.f32 %v683_v1, %v2899_v56  ;;  %v685_v3 = vpop.f32.mrb[69].mxu0 }
 0x1e9   : > { %v686_v4 = vadd.f32 %v685_v3, %v2901_v57  ;;  %v687_v5 = vpop.f32.mrb[70].mxu0  ;;  %1319 = vmatprep.mubr.bf16.mxu1 %v993_v63 }
 0x1ea   : > { %v688_v6 = vadd.f32 %v687_v5, %v2899_v56  ;;  %v689_v7 = vpop.f32.mrb[71].mxu0  ;;  %1320 = vmatmul.mubr.bf16.gmra.mrb[56].mxu1 %v992_v62  ;;  %v900_v9 = vmax.f32 %v684_v2, 0.0 }
 0x1eb   : > { %v690_v8 = vadd.f32 %v689_v7, %v2901_v57  ;;  %v901_v11 = vmax.f32 %v686_v4, 0.0 }
 0x1ec   : > { %v902_v10 = vmax.f32 %v688_v6, 0.0 }
 0x1ed   : > { %v903_v14 = vmax.f32 %v690_v8, 0.0 }
 0x1ee   : > { %v994_v0 = vpack.c.bf16 %v902_v10, %v900_v9 }
 0x1ef   : > { %v995_v15 = vpack.c.bf16 %v903_v14, %v901_v11  ;;  %v693_v16 = vpop.f32.mrb[72].mxu0 }
 0x1f0   : > { %v694_v17 = vadd.f32 %v693_v16, %v2899_v56  ;;  %v695_v18 = vpop.f32.mrb[73].mxu0 }
 0x1f1   : > { %v696_v19 = vadd.f32 %v695_v18, %v2901_v57  ;;  %v697_v20 = vpop.f32.mrb[74].mxu0  ;;  %1327 = vmatprep.mubr.bf16.mxu1 %v995_v15 }
 0x1f2   : > { %v698_v21 = vadd.f32 %v697_v20, %v2899_v56  ;;  %v699_v22 = vpop.f32.mrb[75].mxu0  ;;  %1328 = vmatmul.mubr.bf16.gmra.mrb[60].mxu1 %v994_v0  ;;  %v904_v24 = vmax.f32 %v694_v17, 0.0 }
 0x1f3   : > { %v700_v23 = vadd.f32 %v699_v22, %v2901_v57  ;;  %v905_v26 = vmax.f32 %v696_v19, 0.0 }
 0x1f4   : > { %v906_v25 = vmax.f32 %v698_v21, 0.0 }
 0x1f5   : > { %v907_v27 = vmax.f32 %v700_v23, 0.0 }
 0x1f6   : > { %v996_v28 = vpack.c.bf16 %v906_v25, %v904_v24 }
 0x1f7   : > { %v997_v31 = vpack.c.bf16 %v907_v27, %v905_v26  ;;  %v703_v13 = vpop.f32.mrb[76].mxu0 }
 0x1f8   : > { %v704_v32 = vadd.f32 %v703_v13, %v2899_v56  ;;  %v705_v33 = vpop.f32.mrb[77].mxu0 }
 0x1f9   : > { %v706_v34 = vadd.f32 %v705_v33, %v2901_v57  ;;  %v707_v35 = vpop.f32.mrb[78].mxu0  ;;  %1335 = vmatprep.mubr.bf16.mxu1 %v997_v31 }
 0x1fa   : > { %v708_v36 = vadd.f32 %v707_v35, %v2899_v56  ;;  %v709_v37 = vpop.f32.mrb[79].mxu0  ;;  %1336 = vmatmul.mubr.bf16.gmra.mrb[64].mxu1 %v996_v28  ;;  %v908_v39 = vmax.f32 %v704_v32, 0.0 }
 0x1fb   : > { %v710_v38 = vadd.f32 %v709_v37, %v2901_v57  ;;  %v909_v41 = vmax.f32 %v706_v34, 0.0 }
 0x1fc   : > { %v910_v40 = vmax.f32 %v708_v36, 0.0 }
 0x1fd   : > { %v911_v12 = vmax.f32 %v710_v38, 0.0 }
 0x1fe   : > { %v998_v42 = vpack.c.bf16 %v910_v40, %v908_v39 }
 0x1ff   : > { %v999_v43 = vpack.c.bf16 %v911_v12, %v909_v41  ;;  %v713_v30 = vpop.f32.mrb[80].mxu0 }
 0x200   : > { %v714_v44 = vadd.f32 %v713_v30, %v2899_v56  ;;  %v715_v45 = vpop.f32.mrb[81].mxu0 }
 0x201   : > { %v716_v46 = vadd.f32 %v715_v45, %v2901_v57  ;;  %v717_v47 = vpop.f32.mrb[82].mxu0  ;;  %1343 = vmatprep.mubr.bf16.mxu1 %v999_v43 }
 0x202   : > { %v718_v48 = vadd.f32 %v717_v47, %v2899_v56  ;;  %v719_v49 = vpop.f32.mrb[83].mxu0  ;;  %1344 = vmatmul.mubr.bf16.gmra.mrb[68].mxu1 %v998_v42  ;;  %v912_v51 = vmax.f32 %v714_v44, 0.0 }
 0x203   : > { %v720_v50 = vadd.f32 %v719_v49, %v2901_v57  ;;  %v913_v53 = vmax.f32 %v716_v46, 0.0 }
 0x204   : > { %v914_v52 = vmax.f32 %v718_v48, 0.0 }
 0x205   : > { %v915_v54 = vmax.f32 %v720_v50, 0.0 }
 0x206   : > { %v1000_v55 = vpack.c.bf16 %v914_v52, %v912_v51 }
 0x207   : > { %v1001_v29 = vpack.c.bf16 %v915_v54, %v913_v53  ;;  %v723_v58 = vpop.f32.mrb[84].mxu0 }
 0x208   : > { %v724_v59 = vadd.f32 %v723_v58, %v2899_v56  ;;  %v725_v60 = vpop.f32.mrb[85].mxu0 }
 0x209   : > { %v726_v61 = vadd.f32 %v725_v60, %v2901_v57  ;;  %v727_v62 = vpop.f32.mrb[86].mxu0  ;;  %1351 = vmatprep.mubr.bf16.mxu1 %v1001_v29 }
 0x20a   : > { %v728_v63 = vadd.f32 %v727_v62, %v2899_v56  ;;  %v729_v1 = vpop.f32.mrb[87].mxu0  ;;  %1352 = vmatmul.mubr.bf16.gmra.mrb[72].mxu1 %v1000_v55  ;;  %v916_v3 = vmax.f32 %v724_v59, 0.0 }
 0x20b   : > { %v730_v2 = vadd.f32 %v729_v1, %v2901_v57  ;;  %v917_v5 = vmax.f32 %v726_v61, 0.0 }
 0x20c   : > { %v918_v4 = vmax.f32 %v728_v63, 0.0 }
 0x20d   : > { %v919_v6 = vmax.f32 %v730_v2, 0.0 }
 0x20e   : > { %v1002_v7 = vpack.c.bf16 %v918_v4, %v916_v3 }
 0x20f   : > { %v1003_v8 = vpack.c.bf16 %v919_v6, %v917_v5  ;;  %v733_v9 = vpop.f32.mrb[88].mxu0 }
 0x210   : > { %v734_v10 = vadd.f32 %v733_v9, %v2899_v56  ;;  %v735_v11 = vpop.f32.mrb[89].mxu0 }
 0x211   : > { %v736_v14 = vadd.f32 %v735_v11, %v2901_v57  ;;  %v737_v0 = vpop.f32.mrb[90].mxu0  ;;  %1359 = vmatprep.mubr.bf16.mxu1 %v1003_v8 }
 0x212   : > { %v738_v15 = vadd.f32 %v737_v0, %v2899_v56  ;;  %v739_v16 = vpop.f32.mrb[91].mxu0  ;;  %1360 = vmatmul.mubr.bf16.gmra.mrb[76].mxu1 %v1002_v7  ;;  %v920_v18 = vmax.f32 %v734_v10, 0.0 }
 0x213   : > { %v740_v17 = vadd.f32 %v739_v16, %v2901_v57  ;;  %v921_v20 = vmax.f32 %v736_v14, 0.0 }
 0x214   : > { %v922_v19 = vmax.f32 %v738_v15, 0.0 }
 0x215   : > { %v923_v21 = vmax.f32 %v740_v17, 0.0 }
 0x216   : > { %v1004_v22 = vpack.c.bf16 %v922_v19, %v920_v18 }
 0x217   : > { %v1005_v23 = vpack.c.bf16 %v923_v21, %v921_v20  ;;  %v743_v24 = vpop.f32.mrb[92].mxu0 }
 0x218   : > { %v744_v25 = vadd.f32 %v743_v24, %v2899_v56  ;;  %v745_v26 = vpop.f32.mrb[93].mxu0 }
 0x219   : > { %v746_v27 = vadd.f32 %v745_v26, %v2901_v57  ;;  %v747_v28 = vpop.f32.mrb[94].mxu0  ;;  %1367 = vmatprep.mubr.bf16.mxu1 %v1005_v23 }
 0x21a   : > { %v748_v31 = vadd.f32 %v747_v28, %v2899_v56  ;;  %v749_v13 = vpop.f32.mrb[95].mxu0  ;;  %1368 = vmatmul.mubr.bf16.gmra.mrb[80].mxu1 %v1004_v22  ;;  %v924_v33 = vmax.f32 %v744_v25, 0.0 }
 0x21b   : > { %v750_v32 = vadd.f32 %v749_v13, %v2901_v57  ;;  %v925_v35 = vmax.f32 %v746_v27, 0.0 }
 0x21c   : > { %v926_v34 = vmax.f32 %v748_v31, 0.0 }
 0x21d   : > { %v927_v36 = vmax.f32 %v750_v32, 0.0 }
 0x21e   : > { %v1006_v37 = vpack.c.bf16 %v926_v34, %v924_v33 }
 0x21f   : > { %v1007_v38 = vpack.c.bf16 %v927_v36, %v925_v35  ;;  %v753_v39 = vpop.f32.mrb[96].mxu0 }
 0x220   : > { %v754_v40 = vadd.f32 %v753_v39, %v2899_v56  ;;  %v755_v41 = vpop.f32.mrb[97].mxu0 }
 0x221   : > { %v756_v12 = vadd.f32 %v755_v41, %v2901_v57  ;;  %v757_v42 = vpop.f32.mrb[98].mxu0  ;;  %1375 = vmatprep.mubr.bf16.mxu1 %v1007_v38 }
 0x222   : > { %v758_v43 = vadd.f32 %v757_v42, %v2899_v56  ;;  %v759_v30 = vpop.f32.mrb[99].mxu0  ;;  %1376 = vmatmul.mubr.bf16.gmra.mrb[84].mxu1 %v1006_v37  ;;  %v928_v45 = vmax.f32 %v754_v40, 0.0 }
 0x223   : > { %v760_v44 = vadd.f32 %v759_v30, %v2901_v57  ;;  %v929_v47 = vmax.f32 %v756_v12, 0.0 }
 0x224   : > { %v930_v46 = vmax.f32 %v758_v43, 0.0 }
 0x225   : > { %v931_v48 = vmax.f32 %v760_v44, 0.0 }
 0x226   : > { %v1008_v49 = vpack.c.bf16 %v930_v46, %v928_v45 }
 0x227   : > { %v1009_v50 = vpack.c.bf16 %v931_v48, %v929_v47  ;;  %v763_v51 = vpop.f32.mrb[100].mxu0 }
 0x228   : > { %v764_v52 = vadd.f32 %v763_v51, %v2899_v56  ;;  %v765_v53 = vpop.f32.mrb[101].mxu0 }
 0x229   : > { %v766_v54 = vadd.f32 %v765_v53, %v2901_v57  ;;  %v767_v55 = vpop.f32.mrb[102].mxu0  ;;  %1383 = vmatprep.mubr.bf16.mxu1 %v1009_v50 }
 0x22a   : > { %v768_v29 = vadd.f32 %v767_v55, %v2899_v56  ;;  %v769_v58 = vpop.f32.mrb[103].mxu0  ;;  %1384 = vmatmul.mubr.bf16.gmra.mrb[88].mxu1 %v1008_v49  ;;  %v932_v60 = vmax.f32 %v764_v52, 0.0 }
 0x22b   : > { %v770_v59 = vadd.f32 %v769_v58, %v2901_v57  ;;  %v933_v62 = vmax.f32 %v766_v54, 0.0  ;;  %v3053_v58 = vld [vmem:[%s3217_s4] ss:$0 sm:$0xff] }
 0x22c   : > { %v934_v61 = vmax.f32 %v768_v29, 0.0 }
 0x22d   : > { %v935_v63 = vmax.f32 %v770_v59, 0.0 }
 0x22e   : > { %v1010_v1 = vpack.c.bf16 %v934_v61, %v932_v60 }
 0x22f   : > { %v1011_v2 = vpack.c.bf16 %v935_v63, %v933_v62  ;;  %v773_v3 = vpop.f32.mrb[104].mxu0 }
 0x230   : > { %v774_v4 = vadd.f32 %v773_v3, %v2899_v56  ;;  %v775_v5 = vpop.f32.mrb[105].mxu0 }
 0x231   : > { %v776_v6 = vadd.f32 %v775_v5, %v2901_v57  ;;  %v777_v7 = vpop.f32.mrb[106].mxu0  ;;  %1391 = vmatprep.mubr.bf16.mxu1 %v1011_v2 }
 0x232   : > { %v778_v8 = vadd.f32 %v777_v7, %v2899_v56  ;;  %v779_v9 = vpop.f32.mrb[107].mxu0  ;;  %1392 = vmatmul.mubr.bf16.gmra.mrb[92].mxu1 %v1010_v1  ;;  %v936_v11 = vmax.f32 %v774_v4, 0.0 }
 0x233   : > { %v780_v10 = vadd.f32 %v779_v9, %v2901_v57  ;;  %v937_v0 = vmax.f32 %v776_v6, 0.0 }
 0x234   : > { %v938_v14 = vmax.f32 %v778_v8, 0.0 }
 0x235   : > { %v939_v15 = vmax.f32 %v780_v10, 0.0 }
 0x236   : > { %v1012_v16 = vpack.c.bf16 %v938_v14, %v936_v11 }
 0x237   : > { %v1013_v17 = vpack.c.bf16 %v939_v15, %v937_v0  ;;  %v783_v18 = vpop.f32.mrb[108].mxu0 }
 0x238   : > { %v784_v19 = vadd.f32 %v783_v18, %v2899_v56  ;;  %v785_v20 = vpop.f32.mrb[109].mxu0 }
 0x239   : > { %v786_v21 = vadd.f32 %v785_v20, %v2901_v57  ;;  %v787_v22 = vpop.f32.mrb[110].mxu0  ;;  %1399 = vmatprep.mubr.bf16.mxu1 %v1013_v17 }
 0x23a   : > { %v788_v23 = vadd.f32 %v787_v22, %v2899_v56  ;;  %v789_v24 = vpop.f32.mrb[111].mxu0  ;;  %1400 = vmatmul.mubr.bf16.gmra.mrb[96].mxu1 %v1012_v16  ;;  %v940_v26 = vmax.f32 %v784_v19, 0.0 }
 0x23b   : > { %v790_v25 = vadd.f32 %v789_v24, %v2901_v57  ;;  %v941_v28 = vmax.f32 %v786_v21, 0.0 }
 0x23c   : > { %v942_v27 = vmax.f32 %v788_v23, 0.0 }
 0x23d   : > { %v943_v31 = vmax.f32 %v790_v25, 0.0 }
 0x23e   : > { %v1014_v13 = vpack.c.bf16 %v942_v27, %v940_v26 }
 0x23f   : > { %v1015_v32 = vpack.c.bf16 %v943_v31, %v941_v28  ;;  %v793_v33 = vpop.f32.mrb[112].mxu0 }
 0x240   : > { %v794_v34 = vadd.f32 %v793_v33, %v2899_v56  ;;  %v795_v35 = vpop.f32.mrb[113].mxu0 }
 0x241   : > { %v796_v36 = vadd.f32 %v795_v35, %v2901_v57  ;;  %v797_v37 = vpop.f32.mrb[114].mxu0  ;;  %1407 = vmatprep.mubr.bf16.mxu1 %v1015_v32 }
 0x242   : > { %v798_v38 = vadd.f32 %v797_v37, %v2899_v56  ;;  %v799_v39 = vpop.f32.mrb[115].mxu0  ;;  %1408 = vmatmul.mubr.bf16.gmra.mrb[100].mxu1 %v1014_v13  ;;  %v944_v41 = vmax.f32 %v794_v34, 0.0 }
 0x243   : > { %v800_v40 = vadd.f32 %v799_v39, %v2901_v57  ;;  %v945_v42 = vmax.f32 %v796_v36, 0.0 }
 0x244   : > { %v946_v12 = vmax.f32 %v798_v38, 0.0 }
 0x245   : > { %v947_v43 = vmax.f32 %v800_v40, 0.0 }
 0x246   : > { %v1016_v30 = vpack.c.bf16 %v946_v12, %v944_v41 }
 0x247   : > { %v1017_v44 = vpack.c.bf16 %v947_v43, %v945_v42  ;;  %v803_v45 = vpop.f32.mrb[116].mxu0 }
 0x248   : > { %v804_v46 = vadd.f32 %v803_v45, %v2899_v56  ;;  %v805_v47 = vpop.f32.mrb[117].mxu0 }
 0x249   : > { %v806_v48 = vadd.f32 %v805_v47, %v2901_v57  ;;  %v807_v49 = vpop.f32.mrb[118].mxu0  ;;  %1415 = vmatprep.mubr.bf16.mxu1 %v1017_v44 }
 0x24a   : > { %v808_v50 = vadd.f32 %v807_v49, %v2899_v56  ;;  %v809_v51 = vpop.f32.mrb[119].mxu0  ;;  %1416 = vmatmul.mubr.bf16.gmra.mrb[104].mxu1 %v1016_v30  ;;  %v948_v53 = vmax.f32 %v804_v46, 0.0 }
 0x24b   : > { %v810_v52 = vadd.f32 %v809_v51, %v2901_v57  ;;  %v949_v55 = vmax.f32 %v806_v48, 0.0 }
 0x24c   : > { %v950_v54 = vmax.f32 %v808_v50, 0.0 }
 0x24d   : > { %v951_v29 = vmax.f32 %v810_v52, 0.0  ;;  %v1209_v59 = vpop.f32.mrb[0].mxu1 }
 0x24e   : > { %v1018_v60 = vpack.c.bf16 %v950_v54, %v948_v53  ;;  %v1211_v61 = vpop.f32.mrb[1].mxu1  ;;  %v1210_v2 = vadd.f32 %v3053_v58, %v1209_v59 }
 0x24f   : > { %v1019_v62 = vpack.c.bf16 %v951_v29, %v949_v55  ;;  %v813_v63 = vpop.f32.mrb[120].mxu0  ;;  %v1212_v1 = vpop.f32.mrb[2].mxu1 }
 0x250   : > { %v814_v3 = vadd.f32 %v813_v63, %v2899_v56  ;;  %v1213_v4 = vadd.f32 %v3053_v58, %v1212_v1  ;;  %v815_v5 = vpop.f32.mrb[121].mxu0  ;;  %v1214_v6 = vpop.f32.mrb[3].mxu1 }
 0x251   : > { %v816_v7 = vadd.f32 %v815_v5, %v2901_v57  ;;  %v817_v8 = vpop.f32.mrb[122].mxu0  ;;  %1423 = vmatprep.mubr.bf16.mxu1 %v1019_v62 }
 0x252   : > { %v2068_v9 = vpack.c.bf16 %v1213_v4, %v1210_v2  ;;  %v818_v10 = vadd.f32 %v817_v8, %v2899_v56  ;;  %v819_v11 = vpop.f32.mrb[123].mxu0  ;;  %1424 = vmatmul.mubr.bf16.gmra.mrb[108].mxu1 %v1018_v60  ;;  %v952_v0 = vmax.f32 %v814_v3, 0.0 }
 0x253   : > { %v820_v14 = vadd.f32 %v819_v11, %v2901_v57  ;;  %v953_v16 = vmax.f32 %v816_v7, 0.0 }
 0x254   : > { %2216 = vst [vmem:[%s3062_s13 + $0x10] sm:$0xff] %v2068_v9   ;;  %v954_v15 = vmax.f32 %v818_v10, 0.0 }
 0x255   : > { %v955_v17 = vmax.f32 %v820_v14, 0.0  ;;  %v1217_v18 = vpop.f32.mrb[4].mxu1 }
 0x256   : > { %v1020_v19 = vpack.c.bf16 %v954_v15, %v952_v0  ;;  %v1219_v20 = vpop.f32.mrb[5].mxu1  ;;  %v1218_v24 = vadd.f32 %v3053_v58, %v1217_v18 }
 0x257   : > { %v1021_v21 = vpack.c.bf16 %v955_v17, %v953_v16  ;;  %v823_v22 = vpop.f32.mrb[124].mxu0  ;;  %v1220_v23 = vpop.f32.mrb[6].mxu1 }
 0x258   : > { %v824_v25 = vadd.f32 %v823_v22, %v2899_v56  ;;  %v1221_v26 = vadd.f32 %v3053_v58, %v1220_v23  ;;  %v825_v27 = vpop.f32.mrb[125].mxu0  ;;  %v1222_v28 = vpop.f32.mrb[7].mxu1 }
 0x259   : > { %v826_v31 = vadd.f32 %v825_v27, %v2901_v57  ;;  %v827_v13 = vpop.f32.mrb[126].mxu0  ;;  %1431 = vmatprep.mubr.bf16.mxu1 %v1021_v21 }
 0x25a   : > { %v2073_v32 = vpack.c.bf16 %v1221_v26, %v1218_v24  ;;  %v828_v33 = vadd.f32 %v827_v13, %v2899_v56  ;;  %v829_v34 = vpop.f32.mrb[127].mxu0  ;;  %1432 = vmatmul.mubr.bf16.gmra.mrb[112].mxu1 %v1020_v19  ;;  %v956_v36 = vmax.f32 %v824_v25, 0.0 }
 0x25b   : > { %v830_v35 = vadd.f32 %v829_v34, %v2901_v57  ;;  %v957_v38 = vmax.f32 %v826_v31, 0.0 }
 0x25c   : > { %2217 = vst [vmem:[%s3062_s13 + $0x18] sm:$0xff] %v2073_v32   ;;  %v958_v37 = vmax.f32 %v828_v33, 0.0 }
 0x25d   : > { %v959_v39 = vmax.f32 %v830_v35, 0.0  ;;  %v1225_v40 = vpop.f32.mrb[8].mxu1 }
 0x25e   : > { %v1022_v41 = vpack.c.bf16 %v958_v37, %v956_v36  ;;  %v1227_v12 = vpop.f32.mrb[9].mxu1  ;;  %v1226_v44 = vadd.f32 %v3053_v58, %v1225_v40 }
 0x25f   : > { %v1023_v42 = vpack.c.bf16 %v959_v39, %v957_v38  ;;  %v1193_v43 = vpop.f32.mrb[128].mxu0  ;;  %v1228_v30 = vpop.f32.mrb[10].mxu1 }
 0x260   : > { %v1229_v56 = vadd.f32 %v3053_v58, %v1228_v30  ;;  %v1195_v45 = vpop.f32.mrb[129].mxu0  ;;  %v1230_v46 = vpop.f32.mrb[11].mxu1  ;;  %v1194_v47 = vadd.f32 %v3053_v58, %v1193_v43 }
 0x261   : > { %v1196_v57 = vpop.f32.mrb[130].mxu0  ;;  %1439 = vmatprep.mubr.bf16.mxu1 %v1023_v42 }
 0x262   : > { %v2078_v48 = vpack.c.bf16 %v1229_v56, %v1226_v44  ;;  %v1197_v49 = vadd.f32 %v3053_v58, %v1196_v57  ;;  %v1198_v50 = vpop.f32.mrb[131].mxu0  ;;  %1440 = vmatmul.mubr.bf16.gmra.mrb[116].mxu1 %v1022_v41 }
 0x264   : > { %2218 = vst [vmem:[%s3062_s13 + $0x20] sm:$0xff] %v2078_v48   ;;  %v2058_v51 = vpack.c.bf16 %v1197_v49, %v1194_v47 }
 0x265   : > { %v1233_v52 = vpop.f32.mrb[12].mxu1 }
 0x266   : > { %2059 = vst [vmem:[%s3062_s13] sm:$0xff] %v2058_v51   ;;  %v1235_v53 = vpop.f32.mrb[13].mxu1  ;;  %v1234_v29 = vadd.f32 %v3053_v58, %v1233_v52 }
 0x267   : > { %v1201_v54 = vpop.f32.mrb[132].mxu0  ;;  %v1236_v55 = vpop.f32.mrb[14].mxu1 }
 0x268   : > { %v1237_v59 = vadd.f32 %v3053_v58, %v1236_v55  ;;  %v1203_v60 = vpop.f32.mrb[133].mxu0  ;;  %v1238_v61 = vpop.f32.mrb[15].mxu1  ;;  %v1202_v63 = vadd.f32 %v3053_v58, %v1201_v54 }
 0x269   : > { %v1204_v62 = vpop.f32.mrb[134].mxu0 }
 0x26a   : > { %v2083_v1 = vpack.c.bf16 %v1237_v59, %v1234_v29  ;;  %v1205_v2 = vadd.f32 %v3053_v58, %v1204_v62  ;;  %v1206_v3 = vpop.f32.mrb[135].mxu0 }
 0x26c   : > { %2219 = vst [vmem:[%s3062_s13 + $0x28] sm:$0xff] %v2083_v1   ;;  %v2063_v4 = vpack.c.bf16 %v1205_v2, %v1202_v63 }
 0x26d   : > { %v1241_v5 = vpop.f32.mrb[16].mxu1 }
 0x26e   : > { %2215 = vst [vmem:[%s3062_s13 + $0x8] sm:$0xff] %v2063_v4   ;;  %v1243_v6 = vpop.f32.mrb[17].mxu1  ;;  %v1242_v8 = vadd.f32 %v3053_v58, %v1241_v5 }
 0x26f   : > { %v1244_v7 = vpop.f32.mrb[18].mxu1 }
 0x270   : > { %v1245_v9 = vadd.f32 %v3053_v58, %v1244_v7  ;;  %v1246_v10 = vpop.f32.mrb[19].mxu1 }
 0x272   : > { %v2088_v11 = vpack.c.bf16 %v1245_v9, %v1242_v8 }
 0x274   : > { %2220 = vst [vmem:[%s3062_s13 + $0x30] sm:$0xff] %v2088_v11  }
 0x275   : > { %v1249_v14 = vpop.f32.mrb[20].mxu1 }
 0x276   : > { %v1251_v0 = vpop.f32.mrb[21].mxu1  ;;  %v1250_v16 = vadd.f32 %v3053_v58, %v1249_v14 }
 0x277   : > { %v1252_v15 = vpop.f32.mrb[22].mxu1 }
 0x278   : > { %v1253_v17 = vadd.f32 %v3053_v58, %v1252_v15  ;;  %v1254_v18 = vpop.f32.mrb[23].mxu1 }
 0x27a   : > { %v2093_v19 = vpack.c.bf16 %v1253_v17, %v1250_v16 }
 0x27c   : > { %2221 = vst [vmem:[%s3062_s13 + $0x38] sm:$0xff] %v2093_v19  }
 0x27d   : > { %v1257_v20 = vpop.f32.mrb[24].mxu1 }
 0x27e   : > { %v1259_v21 = vpop.f32.mrb[25].mxu1  ;;  %v1258_v23 = vadd.f32 %v3053_v58, %v1257_v20 }
 0x27f   : > { %v1260_v22 = vpop.f32.mrb[26].mxu1 }
 0x280   : > { %v1261_v24 = vadd.f32 %v3053_v58, %v1260_v22  ;;  %v1262_v25 = vpop.f32.mrb[27].mxu1 }
 0x282   : > { %v2098_v26 = vpack.c.bf16 %v1261_v24, %v1258_v23 }
 0x284   : > { %2222 = vst [vmem:[%s3062_s13 + $0x40] sm:$0xff] %v2098_v26  }
 0x285   : > { %v1265_v27 = vpop.f32.mrb[28].mxu1 }
 0x286   : > { %v1267_v28 = vpop.f32.mrb[29].mxu1  ;;  %v1266_v13 = vadd.f32 %v3053_v58, %v1265_v27 }
 0x287   : > { %v1268_v31 = vpop.f32.mrb[30].mxu1 }
 0x288   : > { %v1269_v32 = vadd.f32 %v3053_v58, %v1268_v31  ;;  %v1270_v33 = vpop.f32.mrb[31].mxu1 }
 0x28a   : > { %v2103_v34 = vpack.c.bf16 %v1269_v32, %v1266_v13 }
 0x28c   : > { %2223 = vst [vmem:[%s3062_s13 + $0x48] sm:$0xff] %v2103_v34  }
 0x28d   : > { %v1273_v35 = vpop.f32.mrb[32].mxu1 }
 0x28e   : > { %v1275_v36 = vpop.f32.mrb[33].mxu1  ;;  %v1274_v38 = vadd.f32 %v3053_v58, %v1273_v35 }
 0x28f   : > { %v1276_v37 = vpop.f32.mrb[34].mxu1 }
 0x290   : > { %v1277_v39 = vadd.f32 %v3053_v58, %v1276_v37  ;;  %v1278_v40 = vpop.f32.mrb[35].mxu1 }
 0x292   : > { %v2108_v41 = vpack.c.bf16 %v1277_v39, %v1274_v38 }
 0x294   : > { %2224 = vst [vmem:[%s3062_s13 + $0x50] sm:$0xff] %v2108_v41  }
 0x295   : > { %v1281_v12 = vpop.f32.mrb[36].mxu1 }
 0x296   : > { %v1283_v42 = vpop.f32.mrb[37].mxu1  ;;  %v1282_v30 = vadd.f32 %v3053_v58, %v1281_v12 }
 0x297   : > { %v1284_v43 = vpop.f32.mrb[38].mxu1 }
 0x298   : > { %v1285_v44 = vadd.f32 %v3053_v58, %v1284_v43  ;;  %v1286_v56 = vpop.f32.mrb[39].mxu1 }
 0x29a   : > { %v2113_v45 = vpack.c.bf16 %v1285_v44, %v1282_v30 }
 0x29c   : > { %2225 = vst [vmem:[%s3062_s13 + $0x58] sm:$0xff] %v2113_v45  }
 0x29d   : > { %v1289_v46 = vpop.f32.mrb[40].mxu1 }
 0x29e   : > { %v1291_v57 = vpop.f32.mrb[41].mxu1  ;;  %v1290_v48 = vadd.f32 %v3053_v58, %v1289_v46 }
 0x29f   : > { %v1292_v47 = vpop.f32.mrb[42].mxu1 }
 0x2a0   : > { %v1293_v49 = vadd.f32 %v3053_v58, %v1292_v47  ;;  %v1294_v50 = vpop.f32.mrb[43].mxu1 }
 0x2a2   : > { %v2118_v51 = vpack.c.bf16 %v1293_v49, %v1290_v48 }
 0x2a4   : > { %2226 = vst [vmem:[%s3062_s13 + $0x60] sm:$0xff] %v2118_v51  }
 0x2a5   : > { %v1297_v52 = vpop.f32.mrb[44].mxu1 }
 0x2a6   : > { %v1299_v53 = vpop.f32.mrb[45].mxu1  ;;  %v1298_v55 = vadd.f32 %v3053_v58, %v1297_v52 }
 0x2a7   : > { %v1300_v54 = vpop.f32.mrb[46].mxu1 }
 0x2a8   : > { %v1301_v29 = vadd.f32 %v3053_v58, %v1300_v54  ;;  %v1302_v59 = vpop.f32.mrb[47].mxu1 }
 0x2aa   : > { %v2123_v60 = vpack.c.bf16 %v1301_v29, %v1298_v55 }
 0x2ac   : > { %2227 = vst [vmem:[%s3062_s13 + $0x68] sm:$0xff] %v2123_v60  }
 0x2ad   : > { %v1305_v61 = vpop.f32.mrb[48].mxu1 }
 0x2ae   : > { %v1307_v62 = vpop.f32.mrb[49].mxu1  ;;  %v1306_v1 = vadd.f32 %v3053_v58, %v1305_v61 }
 0x2af   : > { %v1308_v63 = vpop.f32.mrb[50].mxu1 }
 0x2b0   : > { %v1309_v2 = vadd.f32 %v3053_v58, %v1308_v63  ;;  %v1310_v3 = vpop.f32.mrb[51].mxu1 }
 0x2b2   : > { %v2128_v4 = vpack.c.bf16 %v1309_v2, %v1306_v1 }
 0x2b4   : > { %2228 = vst [vmem:[%s3062_s13 + $0x70] sm:$0xff] %v2128_v4  }
 0x2b5   : > { %v1313_v5 = vpop.f32.mrb[52].mxu1 }
 0x2b6   : > { %v1315_v6 = vpop.f32.mrb[53].mxu1  ;;  %v1314_v8 = vadd.f32 %v3053_v58, %v1313_v5 }
 0x2b7   : > { %v1316_v7 = vpop.f32.mrb[54].mxu1 }
 0x2b8   : > { %v1317_v9 = vadd.f32 %v3053_v58, %v1316_v7  ;;  %v1318_v10 = vpop.f32.mrb[55].mxu1 }
 0x2ba   : > { %v2133_v11 = vpack.c.bf16 %v1317_v9, %v1314_v8 }
 0x2bc   : > { %2229 = vst [vmem:[%s3062_s13 + $0x78] sm:$0xff] %v2133_v11  }
 0x2bd   : > { %v1321_v14 = vpop.f32.mrb[56].mxu1 }
 0x2be   : > { %v1323_v0 = vpop.f32.mrb[57].mxu1  ;;  %v1322_v16 = vadd.f32 %v3053_v58, %v1321_v14 }
 0x2bf   : > { %v1324_v15 = vpop.f32.mrb[58].mxu1 }
 0x2c0   : > { %v1325_v17 = vadd.f32 %v3053_v58, %v1324_v15  ;;  %v1326_v18 = vpop.f32.mrb[59].mxu1 }
 0x2c2   : > { %v2138_v19 = vpack.c.bf16 %v1325_v17, %v1322_v16 }
 0x2c4   : > { %2230 = vst [vmem:[%s3062_s13 + $0x80] sm:$0xff] %v2138_v19  }
 0x2c5   : > { %v1329_v20 = vpop.f32.mrb[60].mxu1 }
 0x2c6   : > { %v1331_v21 = vpop.f32.mrb[61].mxu1  ;;  %v1330_v23 = vadd.f32 %v3053_v58, %v1329_v20 }
 0x2c7   : > { %v1332_v22 = vpop.f32.mrb[62].mxu1 }
 0x2c8   : > { %v1333_v24 = vadd.f32 %v3053_v58, %v1332_v22  ;;  %v1334_v25 = vpop.f32.mrb[63].mxu1 }
 0x2ca   : > { %v2143_v26 = vpack.c.bf16 %v1333_v24, %v1330_v23 }
 0x2cc   : > { %2231 = vst [vmem:[%s3062_s13 + $0x88] sm:$0xff] %v2143_v26  }
 0x2cd   : > { %v1337_v27 = vpop.f32.mrb[64].mxu1 }
 0x2ce   : > { %v1339_v28 = vpop.f32.mrb[65].mxu1  ;;  %v1338_v13 = vadd.f32 %v3053_v58, %v1337_v27 }
 0x2cf   : > { %v1340_v31 = vpop.f32.mrb[66].mxu1 }
 0x2d0   : > { %v1341_v32 = vadd.f32 %v3053_v58, %v1340_v31  ;;  %v1342_v33 = vpop.f32.mrb[67].mxu1 }
 0x2d2   : > { %v2148_v34 = vpack.c.bf16 %v1341_v32, %v1338_v13 }
 0x2d4   : > { %2232 = vst [vmem:[%s3062_s13 + $0x90] sm:$0xff] %v2148_v34  }
 0x2d5   : > { %v1345_v35 = vpop.f32.mrb[68].mxu1 }
 0x2d6   : > { %v1347_v36 = vpop.f32.mrb[69].mxu1  ;;  %v1346_v38 = vadd.f32 %v3053_v58, %v1345_v35 }
 0x2d7   : > { %v1348_v37 = vpop.f32.mrb[70].mxu1 }
 0x2d8   : > { %v1349_v39 = vadd.f32 %v3053_v58, %v1348_v37  ;;  %v1350_v40 = vpop.f32.mrb[71].mxu1 }
 0x2da   : > { %v2153_v41 = vpack.c.bf16 %v1349_v39, %v1346_v38 }
 0x2dc   : > { %2233 = vst [vmem:[%s3062_s13 + $0x98] sm:$0xff] %v2153_v41  }
 0x2dd   : > { %v1353_v12 = vpop.f32.mrb[72].mxu1 }
 0x2de   : > { %v1355_v42 = vpop.f32.mrb[73].mxu1  ;;  %v1354_v30 = vadd.f32 %v3053_v58, %v1353_v12 }
 0x2df   : > { %v1356_v43 = vpop.f32.mrb[74].mxu1 }
 0x2e0   : > { %v1357_v44 = vadd.f32 %v3053_v58, %v1356_v43  ;;  %v1358_v56 = vpop.f32.mrb[75].mxu1 }
 0x2e2   : > { %v2158_v45 = vpack.c.bf16 %v1357_v44, %v1354_v30 }
 0x2e4   : > { %2234 = vst [vmem:[%s3062_s13 + $0xa0] sm:$0xff] %v2158_v45  }
 0x2e5   : > { %v1361_v46 = vpop.f32.mrb[76].mxu1 }
 0x2e6   : > { %v1363_v57 = vpop.f32.mrb[77].mxu1  ;;  %v1362_v48 = vadd.f32 %v3053_v58, %v1361_v46 }
 0x2e7   : > { %v1364_v47 = vpop.f32.mrb[78].mxu1 }
 0x2e8   : > { %v1365_v49 = vadd.f32 %v3053_v58, %v1364_v47  ;;  %v1366_v50 = vpop.f32.mrb[79].mxu1 }
 0x2ea   : > { %v2163_v51 = vpack.c.bf16 %v1365_v49, %v1362_v48 }
 0x2ec   : > { %2235 = vst [vmem:[%s3062_s13 + $0xa8] sm:$0xff] %v2163_v51  }
 0x2ed   : > { %v1369_v52 = vpop.f32.mrb[80].mxu1 }
 0x2ee   : > { %v1371_v53 = vpop.f32.mrb[81].mxu1  ;;  %v1370_v55 = vadd.f32 %v3053_v58, %v1369_v52 }
 0x2ef   : > { %v1372_v54 = vpop.f32.mrb[82].mxu1 }
 0x2f0   : > { %v1373_v29 = vadd.f32 %v3053_v58, %v1372_v54  ;;  %v1374_v59 = vpop.f32.mrb[83].mxu1 }
 0x2f2   : > { %v2168_v60 = vpack.c.bf16 %v1373_v29, %v1370_v55 }
 0x2f4   : > { %2236 = vst [vmem:[%s3062_s13 + $0xb0] sm:$0xff] %v2168_v60  }
 0x2f5   : > { %v1377_v61 = vpop.f32.mrb[84].mxu1 }
 0x2f6   : > { %v1379_v62 = vpop.f32.mrb[85].mxu1  ;;  %v1378_v1 = vadd.f32 %v3053_v58, %v1377_v61 }
 0x2f7   : > { %v1380_v63 = vpop.f32.mrb[86].mxu1 }
 0x2f8   : > { %v1381_v2 = vadd.f32 %v3053_v58, %v1380_v63  ;;  %v1382_v3 = vpop.f32.mrb[87].mxu1 }
 0x2fa   : > { %v2173_v4 = vpack.c.bf16 %v1381_v2, %v1378_v1 }
 0x2fc   : > { %2237 = vst [vmem:[%s3062_s13 + $0xb8] sm:$0xff] %v2173_v4  }
 0x2fd   : > { %v1385_v5 = vpop.f32.mrb[88].mxu1 }
 0x2fe   : > { %v1387_v6 = vpop.f32.mrb[89].mxu1  ;;  %v1386_v8 = vadd.f32 %v3053_v58, %v1385_v5 }
 0x2ff   : > { %v1388_v7 = vpop.f32.mrb[90].mxu1 }
 0x300   : > { %v1389_v9 = vadd.f32 %v3053_v58, %v1388_v7  ;;  %v1390_v10 = vpop.f32.mrb[91].mxu1 }
 0x302   : > { %v2178_v11 = vpack.c.bf16 %v1389_v9, %v1386_v8 }
 0x304   : > { %2238 = vst [vmem:[%s3062_s13 + $0xc0] sm:$0xff] %v2178_v11  }
 0x305   : > { %v1393_v14 = vpop.f32.mrb[92].mxu1 }
 0x306   : > { %v1395_v0 = vpop.f32.mrb[93].mxu1  ;;  %v1394_v16 = vadd.f32 %v3053_v58, %v1393_v14 }
 0x307   : > { %v1396_v15 = vpop.f32.mrb[94].mxu1 }
 0x308   : > { %v1397_v17 = vadd.f32 %v3053_v58, %v1396_v15  ;;  %v1398_v18 = vpop.f32.mrb[95].mxu1 }
 0x30a   : > { %v2183_v19 = vpack.c.bf16 %v1397_v17, %v1394_v16 }
 0x30c   : > { %2239 = vst [vmem:[%s3062_s13 + $0xc8] sm:$0xff] %v2183_v19  }
 0x30d   : > { %v1401_v20 = vpop.f32.mrb[96].mxu1 }
 0x30e   : > { %v1403_v21 = vpop.f32.mrb[97].mxu1  ;;  %v1402_v23 = vadd.f32 %v3053_v58, %v1401_v20 }
 0x30f   : > { %v1404_v22 = vpop.f32.mrb[98].mxu1 }
 0x310   : > { %v1405_v24 = vadd.f32 %v3053_v58, %v1404_v22  ;;  %v1406_v25 = vpop.f32.mrb[99].mxu1 }
 0x312   : > { %v2188_v26 = vpack.c.bf16 %v1405_v24, %v1402_v23 }
 0x314   : > { %2240 = vst [vmem:[%s3062_s13 + $0xd0] sm:$0xff] %v2188_v26  }
 0x315   : > { %v1409_v27 = vpop.f32.mrb[100].mxu1 }
 0x316   : > { %v1411_v28 = vpop.f32.mrb[101].mxu1  ;;  %v1410_v13 = vadd.f32 %v3053_v58, %v1409_v27 }
 0x317   : > { %v1412_v31 = vpop.f32.mrb[102].mxu1 }
 0x318   : > { %v1413_v32 = vadd.f32 %v3053_v58, %v1412_v31  ;;  %v1414_v33 = vpop.f32.mrb[103].mxu1 }
 0x31a   : > { %v2193_v34 = vpack.c.bf16 %v1413_v32, %v1410_v13 }
 0x31c   : > { %2241 = vst [vmem:[%s3062_s13 + $0xd8] sm:$0xff] %v2193_v34  }
 0x31d   : > { %v1417_v35 = vpop.f32.mrb[104].mxu1 }
 0x31e   : > { %v1419_v36 = vpop.f32.mrb[105].mxu1  ;;  %v1418_v38 = vadd.f32 %v3053_v58, %v1417_v35 }
 0x31f   : > { %v1420_v37 = vpop.f32.mrb[106].mxu1 }
 0x320   : > { %v1421_v39 = vadd.f32 %v3053_v58, %v1420_v37  ;;  %v1422_v40 = vpop.f32.mrb[107].mxu1 }
 0x322   : > { %v2198_v41 = vpack.c.bf16 %v1421_v39, %v1418_v38 }
 0x324   : > { %2242 = vst [vmem:[%s3062_s13 + $0xe0] sm:$0xff] %v2198_v41  }
 0x325   : > { %v1425_v12 = vpop.f32.mrb[108].mxu1 }
 0x326   : > { %v1427_v42 = vpop.f32.mrb[109].mxu1  ;;  %v1426_v30 = vadd.f32 %v3053_v58, %v1425_v12 }
 0x327   : > { %v1428_v43 = vpop.f32.mrb[110].mxu1 }
 0x328   : > { %v1429_v44 = vadd.f32 %v3053_v58, %v1428_v43  ;;  %v1430_v56 = vpop.f32.mrb[111].mxu1 }
 0x32a   : > { %v2203_v45 = vpack.c.bf16 %v1429_v44, %v1426_v30 }
 0x32c   : > { %2243 = vst [vmem:[%s3062_s13 + $0xe8] sm:$0xff] %v2203_v45  }
 0x32d   : > { %v1433_v46 = vpop.f32.mrb[112].mxu1 }
 0x32e   : > { %v1435_v57 = vpop.f32.mrb[113].mxu1  ;;  %v1434_v48 = vadd.f32 %v3053_v58, %v1433_v46 }
 0x32f   : > { %v1436_v47 = vpop.f32.mrb[114].mxu1 }
 0x330   : > { %v1437_v49 = vadd.f32 %v3053_v58, %v1436_v47  ;;  %v1438_v50 = vpop.f32.mrb[115].mxu1 }
 0x332   : > { %v2208_v51 = vpack.c.bf16 %v1437_v49, %v1434_v48 }
 0x334   : > { %2244 = vst [vmem:[%s3062_s13 + $0xf0] sm:$0xff] %v2208_v51  }
 0x335   : > { %v1441_v52 = vpop.f32.mrb[116].mxu1 }
 0x336   : > { %v1443_v53 = vpop.f32.mrb[117].mxu1  ;;  %v1442_v55 = vadd.f32 %v3053_v58, %v1441_v52 }
 0x337   : > { %v1444_v54 = vpop.f32.mrb[118].mxu1 }
 0x338   : > { %v1445_v29 = vadd.f32 %v3053_v58, %v1444_v54  ;;  %v1446_v59 = vpop.f32.mrb[119].mxu1 }
 0x33a   : > { %v2213_v60 = vpack.c.bf16 %v1445_v29, %v1442_v55 }
 0x33c   : > { %2245 = vst [vmem:[%s3062_s13 + $0xf8] sm:$0xff] %v2213_v60  }
 0x33d   : > { %2491 = shalt.err (!%p2488_p1)
}
 0x33e   : > { %s2492_s24 = scalar_lea.hbm %s3166_s30, 4096  ;;  %s2496_s16 = scalar_lea.hbm %s3218_s5, 8192 }
 0x33f   : > { %p2493_p13 = scmp.ne.s32.totalorder %s3166_s30, %s2492_s24  ;;  %p2497_p4 = scmp.lt.u32.totalorder %s3166_s30, %s3218_s5 }
 0x340   : > { %p2498_p7 = scmp.lt.u32.totalorder %s2496_s16, %s2492_s24  ;;  %p2500_p11 = scmp.lt.u32.totalorder %s2492_s24, %s3166_s30 }
 0x341   : > { %p2494_p6 = pnand %p2493_p13, %p3232_p0 }
 0x342   : > { %p2499_p8 = por %p2498_p7, %p2497_p4 }
 0x343   : > { %p2495_p10 = pneg %p2494_p6 }
 0x344   : > { %p2501_p2 = por %p2500_p11, %p2499_p8 }
 0x346   : > { %p2502_p3 = pnand %p2501_p2, %p2495_p10 }
 0x348   : > { %2505 = shalt.err (!%p2502_p3)
}
 0x349   : > { %s2559_s14 = smov 64   ;;  %s2560_s29 = smov 4  }
 0x34a   : > { %2288 = dma.vmem_to_hbm [thread:$0]  (%p3232_p0), %s3168_s17, 4096, %s3166_s30, %s1769_s22, %s2559_s14, %s2559_s14, %s2560_s29  }
 0x34b PF: > { %s1797_s12 = sand.u32 1, %s2536_s18   ;;  %p3233_p5 = scmp.ne.s32.totalorder %s3223_s25, 0 }
 0x34c   : > { %p3234_p9 = scmp.ge.s32.totalorder %s2548_s21, 2  ;;  %s1798_s9 = scalar_lea.sflag [#allocation4], %s1797_s12 }
 0x34e   : > { %p2302_p12 = pnand %p3234_p9, %p3233_p5 }
 0x350   : > { %2531 = dma.done.wait (!%p2302_p12), %s1798_s9, 4096  }
 0x351   : > { %2533 = vsyncadd (!%p2302_p12), %s1798_s9, 4294963200  ;;  %p19_p1 = scmp.ge.s32.totalorder %s2704_s23, 4   ;;  %s3235_s18 = smov %s2540_s19 }
 0x352   : > { %s3236_s19 = smov %s2544_s20  ;;  %s3237_s20 = smov %s2713_s7 }
 0x353   : > { %s3238_s21 = smov %s2704_s23  ;;  %21 = sbr.rel (!%p19_p1) target bundleno = 6 (0x6), region = 93 }
 0x35a   :  { %1803 = vsyncpa [#allocation3], 1 }
 0x35b   :  { %1805 = vsyncpa [#allocation3 + $0x1], 1 }
 0x35c   :  { %1806 = vsyncpa [#allocation6], 1 }
 0x35d   :  { %1807 = vsyncpa [#allocation4], 1 }
 0x35e   :  { %1809 = vsyncpa [#allocation4 + $0x1], 1 }

</bundles_post_ra>
